<compile_context>
chip_gen: v7x
topology: tpu7x:2x2x1
jax: 0.10.0
libtpu: 0.0.40
codegen_flags: <defaults>
</compile_context>

<pallas_src>
from functools import partial

import jax
import jax.numpy as jnp
from jax.experimental import pallas as pl
from jax.experimental.pallas import tpu as pltpu


def d_icsf_kernel(x_ref, wband_ref, w_dw_ref, dw_shift_ref,
                  up_ok_ref, dn_ok_ref,
                  se1_w_ref, se1_b_ref, se2_w_ref, se2_b_ref,
                  bn_scale_ref, bn_shift_ref,
                  out_ref, *, H, W, Cout):
    Bb = x_ref.shape[0]
    K3 = x_ref.shape[2]
    WC = W * Cout
    M = Bb * H

    # ---- one fused MXU matmul: columns = [pre | post | residual], lane-dense ----
    x2d = x_ref[...].reshape(M, K3)                          # (M, 3*Kin)
    acc = jnp.dot(x2d, wband_ref[...],
                  preferred_element_type=jnp.float32)        # (M, 3*W*Cout) f32

    pre = jnp.maximum(acc[:, 0 * WC:1 * WC], 0.0)            # (M, W*Cout)
    post = jnp.maximum(acc[:, 1 * WC:2 * WC], 0.0)
    res = acc[:, 2 * WC:3 * WC]

    # ---- fusion = |pre - post| + (pre + post) ----
    fusion = jnp.abs(pre - post) + pre + post                # (M, W*Cout)

    # ---- depthwise 3x3 (BN_dw scale + kx border masks folded into taps) ----
    f_l = pltpu.roll(fusion, Cout, axis=1)                   # source column w-1
    f_r = pltpu.roll(fusion, WC - Cout, axis=1)              # source column w+1

    def tap(t):
        return w_dw_ref[t:t + 1, :]                          # (1, W*Cout)

    row_top = f_l * tap(0) + fusion * tap(1) + f_r * tap(2)  # kernel row ky = 0
    row_mid = f_l * tap(3) + fusion * tap(4) + f_r * tap(5)  # ky = 1
    row_bot = f_l * tap(6) + fusion * tap(7) + f_r * tap(8)  # ky = 2

    dw = (row_mid
          + pltpu.roll(row_top, 1, axis=0) * up_ok_ref[...]        # source row h-1
          + pltpu.roll(row_bot, M - 1, axis=0) * dn_ok_ref[...])   # source row h+1

    out = jnp.maximum(dw + dw_shift_ref[...], 0.0)           # BN_dw shift + relu

    # ---- squeeze-and-excitation (VPU/XLU, vectorized over squeeze channels) ----
    out3 = out.reshape(Bb, H, WC)
    rowsum = jnp.sum(out3, axis=1)                           # (Bb, W*Cout)
    # se1_w_ref carries the 1/(H*W) mean factor, tiled over W.
    hidden = jnp.sum(rowsum[:, None, :] * se1_w_ref[...], axis=-1)   # (Bb, Cmid)
    hidden = jnp.maximum(hidden + se1_b_ref[...], 0.0)
    se = jnp.sum(hidden[:, :, None] * se2_w_ref[...], axis=1)        # (Bb, W*Cout)
    se = jax.nn.sigmoid(se + se2_b_ref[...])

    gated = (out3 * se[:, None, :]).reshape(M, WC)

    # ---- SE scale, residual add, final BN (+ folded residual bias) + relu ----
    y = jnp.maximum((gated + res) * bn_scale_ref[...] + bn_shift_ref[...], 0.0)
    out_ref[...] = y.reshape(Bb, H, WC)


def _default_num_blocks(batch):
    """One grid step on single-TC chips; two 'parallel' steps on multi-TC chips."""
    try:
        kind = jax.devices()[0].device_kind.lower()
    except Exception:
        return 1
    multi_tc = any(tag in kind for tag in ('v7', '7x', 'v4', 'v5p'))
    return 2 if (multi_tc and batch % 2 == 0) else 1


def prepare_icsf_params(params, H, W, dtype=jnp.bfloat16):
    """One-time packing of D_ICSFBlock parameters into kernel-ready arrays.

    Call once per parameter set (outside the hot path) and reuse the result;
    the per-call path is then just the activation slab + one pallas_call.
    """
    f32 = jnp.float32
    Cin, Cout = params['w_pre'].shape[2], params['w_pre'].shape[3]
    C2 = 2 * Cin
    Kin = (W + 2) * C2
    WC = W * Cout

    # -- block-banded weight: one matmul yields [pre | post | residual] lane-dense --
    def band_block(tap_w, kx):
        # tap_w: (2*Cin, Cout); placed at rows (w+kx)*2Cin + c, cols w*Cout + o.
        blk = jnp.einsum('wv,co->wcvo', jnp.eye(W, dtype=f32), tap_w.astype(f32))
        blk = blk.reshape(W * C2, WC)
        return jnp.pad(blk, ((kx * C2, (2 - kx) * C2), (0, 0)))

    zero_io = jnp.zeros((Cin, Cout), f32)
    bands = []
    for ky in range(3):
        pre_blk = sum(band_block(jnp.concatenate([params['w_pre'][ky, kx], zero_io], 0), kx)
                      for kx in range(3))
        post_blk = sum(band_block(jnp.concatenate([zero_io, params['w_post'][ky, kx]], 0), kx)
                       for kx in range(3))
        if ky == 1:    # residual 1x1 hits only the spatial center tap
            res_blk = band_block(jnp.concatenate([params['res_w'][0],
                                                  params['res_w'][1]], 0), 1)
        else:
            res_blk = jnp.zeros((Kin, WC), f32)
        bands.append(jnp.concatenate([pre_blk, post_blk, res_blk], axis=1))
    # Fused over ky: rows [ky*Kin, (ky+1)*Kin) pair with padded input rows [ky, ky+H).
    # TODO(synk): ~83% of this band is structural zeros; if weight DMA ever
    #   dominates (larger W), generate it in VMEM from the raw 3x3 weights instead.
    wband = jnp.concatenate(bands, axis=0).astype(dtype)      # (3*Kin, 3*W*Cout)

    def tile_w(v):                                            # (1, Cout) -> (1, W*Cout)
        return jnp.tile(jnp.asarray(v, f32).reshape(1, Cout), (1, W))

    # depthwise taps: BN_dw scale folded in, kx border columns zeroed out
    wdw = (params['w_dw'] * params['bn_dw_scale'].reshape(1, 1, Cout)).astype(f32)  # (3,3,Cout)
    kx_mask = jnp.ones((3, W), f32).at[0, 0].set(0.0).at[2, W - 1].set(0.0)         # (kx, w)
    w_dw_lane = (wdw[:, :, None, :] * kx_mask[None, :, :, None]).reshape(9, WC)

    return {
        'wband': wband,
        'w_dw': w_dw_lane,
        'dw_shift': tile_w(params['bn_dw_shift']),
        'se1_w': (jnp.tile(params['se1_w'].T.astype(f32), (1, W)) / float(H * W)),  # (Cmid, W*Cout)
        'se1_b': params['se1_b'].astype(f32),                 # (1, Cmid)
        'se2_w': jnp.tile(params['se2_w'].astype(f32), (1, W)),   # (Cmid, W*Cout)
        'se2_b': tile_w(params['se2_b']),
        'bn_scale': tile_w(params['bn_scale']),
        # fold residual bias into the final BN shift: (x + b)*s + t = x*s + (b*s + t)
        'bn_shift': tile_w(params['bn_shift'] + params['res_b'] * params['bn_scale']),
    }


def d_icsf_block(pre_feat, post_feat, prepped, num_blocks=None):
    B, H, W, Cin = pre_feat.shape
    WC = prepped['bn_scale'].shape[1]
    Cout = WC // W
    Cmid = prepped['se1_b'].shape[1]
    Kin = (W + 2) * 2 * Cin
    act_dtype = prepped['wband'].dtype

    if num_blocks is None:
        num_blocks = _default_num_blocks(B)
    assert B % num_blocks == 0
    Bb = B // num_blocks
    M = Bb * H

    # -- lane-dense, ky-unrolled activation slab: slab[:, h, ky*Kin + j] = x_pad[:, h+ky, j] --
    pre_pad = jnp.pad(pre_feat, ((0, 0), (1, 1), (1, 1), (0, 0)))
    post_pad = jnp.pad(post_feat, ((0, 0), (1, 1), (1, 1), (0, 0)))
    x = jnp.concatenate([pre_pad, post_pad], axis=-1).reshape(B, H + 2, Kin)
    x_slab = jnp.concatenate([x[:, 0:H], x[:, 1:H + 1], x[:, 2:H + 2]],
                             axis=-1).astype(act_dtype)       # (B, H, 3*Kin)

    # per-row validity of the ky=0 / ky=2 depthwise contributions (batch-fold safe)
    r = jnp.arange(M) % H
    up_ok = (r > 0).astype(jnp.float32).reshape(M, 1)
    dn_ok = (r < H - 1).astype(jnp.float32).reshape(M, 1)

    def full(shape):
        n = len(shape)
        return pl.BlockSpec(shape, lambda i, n=n: (0,) * n)

    in_specs = [
        pl.BlockSpec((Bb, H, 3 * Kin), lambda i: (i, 0, 0)),  # activation slab
        full((3 * Kin, 3 * WC)),     # banded conv/residual weights
        full((9, WC)),               # depthwise taps (BN_dw scale + kx masks folded)
        full((1, WC)),               # BN_dw shift
        full((M, 1)),                # ky=0 row mask
        full((M, 1)),                # ky=2 row mask
        full((Cmid, WC)),            # SE fc1 weight (mean factor folded)
        full((1, Cmid)),             # SE fc1 bias
        full((Cmid, WC)),            # SE fc2 weight
        full((1, WC)),               # SE fc2 bias
        full((1, WC)),               # final BN scale
        full((1, WC)),               # final BN shift (+ residual bias folded)
    ]
    out_specs = pl.BlockSpec((Bb, H, WC), lambda i: (i, 0, 0))  # lane-dense output

    grid_spec = pltpu.PrefetchScalarGridSpec(
        num_scalar_prefetch=0,
        grid=(num_blocks,),
        in_specs=in_specs,
        out_specs=out_specs,
    )

    kernel = partial(d_icsf_kernel, H=H, W=W, Cout=Cout)
    out = pl.pallas_call(
        kernel,
        out_shape=jax.ShapeDtypeStruct((B, H, WC), jnp.float32),
        grid_spec=grid_spec,
        compiler_params=pltpu.CompilerParams(
            dimension_semantics=("parallel",)),   # batch blocks are independent
    )(x_slab, prepped['wband'], prepped['w_dw'], prepped['dw_shift'],
      up_ok, dn_ok,
      prepped['se1_w'], prepped['se1_b'], prepped['se2_w'], prepped['se2_b'],
      prepped['bn_scale'], prepped['bn_shift'])

    return out.reshape(B, H, W, Cout)


def reference(pre_feat, post_feat, params):
    """Pure-JAX reference (NHWC) for correctness checking."""
    Cout = params['w_pre'].shape[-1]
    Cin = pre_feat.shape[-1]
    dn = ('NHWC', 'HWIO', 'NHWC')
    conv = lambda x, w, g=1: jax.lax.conv_general_dilated(
        x, w, (1, 1), 'SAME', dimension_numbers=dn, feature_group_count=g)

    pre = jax.nn.relu(conv(pre_feat, params['w_pre']))
    post = jax.nn.relu(conv(post_feat, params['w_post']))
    fusion = jnp.abs(pre - post) + pre + post
    dw = conv(fusion, params['w_dw'].reshape(3, 3, 1, Cout), g=Cout)
    out = jax.nn.relu(dw * params['bn_dw_scale'] + params['bn_dw_shift'])
    se = out.mean(axis=(1, 2), keepdims=True)
    se = jax.nn.relu(jnp.einsum('bhwc,cd->bhwd', se, params['se1_w']) + params['se1_b'])
    se = jax.nn.sigmoid(jnp.einsum('bhwc,cd->bhwd', se, params['se2_w']) + params['se2_b'])
    out = out * se
    cat = jnp.concatenate([pre_feat, post_feat], axis=-1)
    res = jnp.einsum('bhwc,cd->bhwd', cat, params['res_w'].reshape(2 * Cin, Cout)) \
        + params['res_b']
    out = out + res
    return jax.nn.relu(out * params['bn_scale'] + params['bn_shift'])


def make_params(key, Cin, Cout):
    Cmid = max(Cout // 8, 1)
    ks = jax.random.split(key, 20)
    nrm = lambda k, shape, s=0.2: (jax.random.normal(k, shape) * s).astype(jnp.float32)

    def bn_params(k):
        k1, k2, k3, k4 = jax.random.split(k, 4)
        gamma = 1.0 + 0.1 * jax.random.normal(k1, (1, Cout))
        beta = 0.05 * jax.random.normal(k2, (1, Cout))
        mean = 0.1 * jax.random.normal(k3, (1, Cout))
        var = 0.5 + 0.1 * jnp.abs(jax.random.normal(k4, (1, Cout)))
        scale = gamma / jnp.sqrt(var + 1e-5)
        shift = beta - mean * scale
        return scale.astype(jnp.float32), shift.astype(jnp.float32)

    bn_dw_scale, bn_dw_shift = bn_params(ks[10])
    bn_scale, bn_shift = bn_params(ks[11])
    return {
        'w_pre':  nrm(ks[0], (3, 3, Cin, Cout)),
        'w_post': nrm(ks[1], (3, 3, Cin, Cout)),
        'w_dw':   nrm(ks[2], (3, 3, Cout)),
        'bn_dw_scale': bn_dw_scale, 'bn_dw_shift': bn_dw_shift,
        'se1_w': nrm(ks[3], (Cout, Cmid)),
        'se1_b': nrm(ks[4], (1, Cmid)),
        'se2_w': nrm(ks[5], (Cmid, Cout)),
        'se2_b': nrm(ks[6], (1, Cout)),
        'res_w': nrm(ks[7], (2, Cin, Cout)),   # [0]=pre half, [1]=post half
        'res_b': nrm(ks[8], (1, Cout)),
        'bn_scale': bn_scale, 'bn_shift': bn_shift,
    }


if __name__ == "__main__":
    B, H, W = 2, 16, 16
    Cin, Cout = 4, 8

    key = jax.random.PRNGKey(0)
    k_pre, k_post, k_par = jax.random.split(key, 3)
    # NHWC inputs (equivalent to PyTorch NCHW [2, 4, 16, 16]).
    pre_feat = jax.random.normal(k_pre, (B, H, W, Cin), dtype=jnp.float32)
    post_feat = jax.random.normal(k_post, (B, H, W, Cin), dtype=jnp.float32)
    params = make_params(k_par, Cin, Cout)

    ref = jax.block_until_ready(reference(pre_feat, post_feat, params))

    # --- exactness check: f32 weights/activations, strict tolerance ---
    prepped_f32 = prepare_icsf_params(params, H, W, dtype=jnp.float32)
    out_f32 = jax.block_until_ready(d_icsf_block(pre_feat, post_feat, prepped_f32))
    assert out_f32.shape == (B, H, W, Cout)
    assert jnp.allclose(out_f32, ref, atol=1e-4, rtol=1e-4), \
        f"f32 max abs err {jnp.max(jnp.abs(out_f32 - ref))}"

    # --- fast path: bf16 weights/activations, f32 accumulation (halves weight DMA) ---
    prepped_bf16 = prepare_icsf_params(params, H, W, dtype=jnp.bfloat16)
    run = jax.jit(d_icsf_block)                      # prep already hoisted; jit the hot path
    out_bf16 = jax.block_until_ready(run(pre_feat, post_feat, prepped_bf16))
    assert jnp.allclose(out_bf16, ref, atol=5e-2, rtol=5e-2), \
        f"bf16 max abs err {jnp.max(jnp.abs(out_bf16 - ref))}"

    print("KERNEL_OK")
</pallas_src>

<mosaic_0001>
module attributes {stable_mosaic.version = 11 : i64} {
  func.func @d_icsf_kernel(%arg0: i32, %arg1: memref<2x16x432xf32, #tpu.memory_space<vmem>>, %arg2: memref<432x384xf32, #tpu.memory_space<vmem>>, %arg3: memref<9x128xf32, #tpu.memory_space<vmem>>, %arg4: memref<1x128xf32, #tpu.memory_space<vmem>>, %arg5: memref<32x1xf32, #tpu.memory_space<vmem>>, %arg6: memref<32x1xf32, #tpu.memory_space<vmem>>, %arg7: memref<1x128xf32, #tpu.memory_space<vmem>>, %arg8: memref<1x1xf32, #tpu.memory_space<vmem>>, %arg9: memref<1x128xf32, #tpu.memory_space<vmem>>, %arg10: memref<1x128xf32, #tpu.memory_space<vmem>>, %arg11: memref<1x128xf32, #tpu.memory_space<vmem>>, %arg12: memref<1x128xf32, #tpu.memory_space<vmem>>, %arg13: memref<2x16x128xf32, #tpu.memory_space<vmem>>) attributes {dimension_semantics = [#tpu.dimension_semantics<parallel>], iteration_bounds = array<i64: 1>, scalar_prefetch = 0 : i64, scratch_operands = 0 : i64, tpu.core_type = #tpu.core_type<tc>, window_params = [{transform_indices = @transform_0, window_bounds = array<i64: 2, 16, 432>}, {pipeline_mode = #tpu.pipeline_mode<synchronous>, transform_indices = @transform_1, window_bounds = array<i64: 432, 384>}, {pipeline_mode = #tpu.pipeline_mode<synchronous>, transform_indices = @transform_2, window_bounds = array<i64: 9, 128>}, {pipeline_mode = #tpu.pipeline_mode<synchronous>, transform_indices = @transform_3, window_bounds = array<i64: 1, 128>}, {pipeline_mode = #tpu.pipeline_mode<synchronous>, transform_indices = @transform_4, window_bounds = array<i64: 32, 1>}, {pipeline_mode = #tpu.pipeline_mode<synchronous>, transform_indices = @transform_5, window_bounds = array<i64: 32, 1>}, {pipeline_mode = #tpu.pipeline_mode<synchronous>, transform_indices = @transform_6, window_bounds = array<i64: 1, 128>}, {pipeline_mode = #tpu.pipeline_mode<synchronous>, transform_indices = @transform_7, window_bounds = array<i64: 1, 1>}, {pipeline_mode = #tpu.pipeline_mode<synchronous>, transform_indices = @transform_8, window_bounds = array<i64: 1, 128>}, {pipeline_mode = #tpu.pipeline_mode<synchronous>, transform_indices = @transform_9, window_bounds = array<i64: 1, 128>}, {pipeline_mode = #tpu.pipeline_mode<synchronous>, transform_indices = @transform_10, window_bounds = array<i64: 1, 128>}, {pipeline_mode = #tpu.pipeline_mode<synchronous>, transform_indices = @transform_11, window_bounds = array<i64: 1, 128>}, {transform_indices = @transform_12, window_bounds = array<i64: 2, 16, 128>}]} {
    %c0 = arith.constant 0 : index
    %c0_0 = arith.constant 0 : index
    %c0_1 = arith.constant 0 : index
    %0 = vector.load %arg1[%c0, %c0_0, %c0_1] : memref<2x16x432xf32, #tpu.memory_space<vmem>>, vector<2x16x432xf32>
    %1 = vector.shape_cast %0 : vector<2x16x432xf32> to vector<32x432xf32>
    %c0_2 = arith.constant 0 : index
    %c0_3 = arith.constant 0 : index
    %2 = vector.load %arg2[%c0_2, %c0_3] : memref<432x384xf32, #tpu.memory_space<vmem>>, vector<432x384xf32>
    %cst = arith.constant dense<0.000000e+00> : vector<32x384xf32>
    %3 = tpu.matmul %1, %2, %cst {dimension_numbers = #tpu.dot_dimension_numbers<[1], [0], [0], [1], [0, 0, 1, 1], [], []>} : vector<32x432xf32>, vector<432x384xf32>, vector<32x384xf32> -> vector<32x384xf32>
    %4 = vector.extract_strided_slice %3 {offsets = [0, 0], sizes = [32, 128], strides = [1, 1]} : vector<32x384xf32> to vector<32x128xf32>
    %cst_4 = arith.constant 0.000000e+00 : f32
    %5 = vector.broadcast %cst_4 : f32 to vector<32x128xf32>
    %6 = arith.maximumf %4, %5 : vector<32x128xf32>
    %7 = vector.extract_strided_slice %3 {offsets = [0, 128], sizes = [32, 128], strides = [1, 1]} : vector<32x384xf32> to vector<32x128xf32>
    %cst_5 = arith.constant 0.000000e+00 : f32
    %8 = vector.broadcast %cst_5 : f32 to vector<32x128xf32>
    %9 = arith.maximumf %7, %8 : vector<32x128xf32>
    %10 = vector.extract_strided_slice %3 {offsets = [0, 256], sizes = [32, 128], strides = [1, 1]} : vector<32x384xf32> to vector<32x128xf32>
    %11 = arith.subf %6, %9 : vector<32x128xf32>
    %12 = math.absf %11 : vector<32x128xf32>
    %13 = arith.addf %12, %6 : vector<32x128xf32>
    %14 = arith.addf %13, %9 : vector<32x128xf32>
    %c8_i32 = arith.constant 8 : i32
    %15 = tpu.dynamic_rotate %14 by %c8_i32 dim 1 : vector<32x128xf32>, i32 -> vector<32x128xf32>
    %c120_i32 = arith.constant 120 : i32
    %16 = tpu.dynamic_rotate %14 by %c120_i32 dim 1 : vector<32x128xf32>, i32 -> vector<32x128xf32>
    %c0_6 = arith.constant 0 : index
    %c0_7 = arith.constant 0 : index
    %17 = vector.load %arg3[%c0_6, %c0_7] : memref<9x128xf32, #tpu.memory_space<vmem>>, vector<1x128xf32>
    %18 = vector.broadcast %17 : vector<1x128xf32> to vector<32x128xf32>
    %19 = arith.mulf %15, %18 : vector<32x128xf32>
    %c1 = arith.constant 1 : index
    %c0_8 = arith.constant 0 : index
    %20 = vector.load %arg3[%c1, %c0_8] : memref<9x128xf32, #tpu.memory_space<vmem>>, vector<1x128xf32>
    %21 = vector.broadcast %20 : vector<1x128xf32> to vector<32x128xf32>
    %22 = arith.mulf %14, %21 : vector<32x128xf32>
    %23 = arith.addf %19, %22 : vector<32x128xf32>
    %c2 = arith.constant 2 : index
    %c0_9 = arith.constant 0 : index
    %24 = vector.load %arg3[%c2, %c0_9] : memref<9x128xf32, #tpu.memory_space<vmem>>, vector<1x128xf32>
    %25 = vector.broadcast %24 : vector<1x128xf32> to vector<32x128xf32>
    %26 = arith.mulf %16, %25 : vector<32x128xf32>
    %27 = arith.addf %23, %26 : vector<32x128xf32>
    %c3 = arith.constant 3 : index
    %c0_10 = arith.constant 0 : index
    %28 = vector.load %arg3[%c3, %c0_10] : memref<9x128xf32, #tpu.memory_space<vmem>>, vector<1x128xf32>
    %29 = vector.broadcast %28 : vector<1x128xf32> to vector<32x128xf32>
    %30 = arith.mulf %15, %29 : vector<32x128xf32>
    %c4 = arith.constant 4 : index
    %c0_11 = arith.constant 0 : index
    %31 = vector.load %arg3[%c4, %c0_11] : memref<9x128xf32, #tpu.memory_space<vmem>>, vector<1x128xf32>
    %32 = vector.broadcast %31 : vector<1x128xf32> to vector<32x128xf32>
    %33 = arith.mulf %14, %32 : vector<32x128xf32>
    %34 = arith.addf %30, %33 : vector<32x128xf32>
    %c5 = arith.constant 5 : index
    %c0_12 = arith.constant 0 : index
    %35 = vector.load %arg3[%c5, %c0_12] : memref<9x128xf32, #tpu.memory_space<vmem>>, vector<1x128xf32>
    %36 = vector.broadcast %35 : vector<1x128xf32> to vector<32x128xf32>
    %37 = arith.mulf %16, %36 : vector<32x128xf32>
    %38 = arith.addf %34, %37 : vector<32x128xf32>
    %c6 = arith.constant 6 : index
    %c0_13 = arith.constant 0 : index
    %39 = vector.load %arg3[%c6, %c0_13] : memref<9x128xf32, #tpu.memory_space<vmem>>, vector<1x128xf32>
    %40 = vector.broadcast %39 : vector<1x128xf32> to vector<32x128xf32>
    %41 = arith.mulf %15, %40 : vector<32x128xf32>
    %c7 = arith.constant 7 : index
    %c0_14 = arith.constant 0 : index
    %42 = vector.load %arg3[%c7, %c0_14] : memref<9x128xf32, #tpu.memory_space<vmem>>, vector<1x128xf32>
    %43 = vector.broadcast %42 : vector<1x128xf32> to vector<32x128xf32>
    %44 = arith.mulf %14, %43 : vector<32x128xf32>
    %45 = arith.addf %41, %44 : vector<32x128xf32>
    %c8 = arith.constant 8 : index
    %c0_15 = arith.constant 0 : index
    %46 = vector.load %arg3[%c8, %c0_15] : memref<9x128xf32, #tpu.memory_space<vmem>>, vector<1x128xf32>
    %47 = vector.broadcast %46 : vector<1x128xf32> to vector<32x128xf32>
    %48 = arith.mulf %16, %47 : vector<32x128xf32>
    %49 = arith.addf %45, %48 : vector<32x128xf32>
    %c1_i32 = arith.constant 1 : i32
    %50 = tpu.dynamic_rotate %27 by %c1_i32 dim 0 : vector<32x128xf32>, i32 -> vector<32x128xf32>
    %c0_16 = arith.constant 0 : index
    %c0_17 = arith.constant 0 : index
    %51 = vector.load %arg5[%c0_16, %c0_17] : memref<32x1xf32, #tpu.memory_space<vmem>>, vector<32x1xf32>
    %52 = vector.broadcast %51 : vector<32x1xf32> to vector<32x128xf32>
    %53 = arith.mulf %50, %52 : vector<32x128xf32>
    %54 = arith.addf %38, %53 : vector<32x128xf32>
    %c31_i32 = arith.constant 31 : i32
    %55 = tpu.dynamic_rotate %49 by %c31_i32 dim 0 : vector<32x128xf32>, i32 -> vector<32x128xf32>
    %c0_18 = arith.constant 0 : index
    %c0_19 = arith.constant 0 : index
    %56 = vector.load %arg6[%c0_18, %c0_19] : memref<32x1xf32, #tpu.memory_space<vmem>>, vector<32x1xf32>
    %57 = vector.broadcast %56 : vector<32x1xf32> to vector<32x128xf32>
    %58 = arith.mulf %55, %57 : vector<32x128xf32>
    %59 = arith.addf %54, %58 : vector<32x128xf32>
    %c0_20 = arith.constant 0 : index
    %c0_21 = arith.constant 0 : index
    %60 = vector.load %arg4[%c0_20, %c0_21] : memref<1x128xf32, #tpu.memory_space<vmem>>, vector<1x128xf32>
    %61 = vector.broadcast %60 : vector<1x128xf32> to vector<32x128xf32>
    %62 = arith.addf %59, %61 : vector<32x128xf32>
    %cst_22 = arith.constant 0.000000e+00 : f32
    %63 = vector.broadcast %cst_22 : f32 to vector<32x128xf32>
    %64 = arith.maximumf %62, %63 : vector<32x128xf32>
    %65 = vector.shape_cast %64 : vector<32x128xf32> to vector<2x16x128xf32>
    %cst_23 = arith.constant dense<0.000000e+00> : vector<2x128xf32>
    %66 = vector.multi_reduction <add>, %65, %cst_23 [1] : vector<2x16x128xf32> to vector<2x128xf32>
    %67 = vector.shape_cast %66 : vector<2x128xf32> to vector<2x1x128xf32>
    %c0_24 = arith.constant 0 : index
    %c0_25 = arith.constant 0 : index
    %68 = vector.load %arg7[%c0_24, %c0_25] : memref<1x128xf32, #tpu.memory_space<vmem>>, vector<1x128xf32>
    %69 = vector.shape_cast %68 : vector<1x128xf32> to vector<1x1x128xf32>
    %70 = vector.broadcast %69 : vector<1x1x128xf32> to vector<2x1x128xf32>
    %71 = arith.mulf %67, %70 : vector<2x1x128xf32>
    %cst_26 = arith.constant dense<0.000000e+00> : vector<2x1xf32>
    %72 = vector.multi_reduction <add>, %71, %cst_26 [2] : vector<2x1x128xf32> to vector<2x1xf32>
    %c0_27 = arith.constant 0 : index
    %c0_28 = arith.constant 0 : index
    %73 = vector.load %arg8[%c0_27, %c0_28] : memref<1x1xf32, #tpu.memory_space<vmem>>, vector<1x1xf32>
    %74 = vector.broadcast %73 : vector<1x1xf32> to vector<2x1xf32>
    %75 = arith.addf %72, %74 : vector<2x1xf32>
    %cst_29 = arith.constant 0.000000e+00 : f32
    %76 = vector.broadcast %cst_29 : f32 to vector<2x1xf32>
    %77 = arith.maximumf %75, %76 : vector<2x1xf32>
    %78 = vector.shape_cast %77 : vector<2x1xf32> to vector<2x1x1xf32>
    %c0_30 = arith.constant 0 : index
    %c0_31 = arith.constant 0 : index
    %79 = vector.load %arg9[%c0_30, %c0_31] : memref<1x128xf32, #tpu.memory_space<vmem>>, vector<1x128xf32>
    %80 = vector.shape_cast %79 : vector<1x128xf32> to vector<1x1x128xf32>
    %81 = vector.broadcast %78 : vector<2x1x1xf32> to vector<2x1x128xf32>
    %82 = vector.broadcast %80 : vector<1x1x128xf32> to vector<2x1x128xf32>
    %83 = arith.mulf %81, %82 : vector<2x1x128xf32>
    %cst_32 = arith.constant dense<0.000000e+00> : vector<2x128xf32>
    %84 = vector.multi_reduction <add>, %83, %cst_32 [1] : vector<2x1x128xf32> to vector<2x128xf32>
    %c0_33 = arith.constant 0 : index
    %c0_34 = arith.constant 0 : index
    %85 = vector.load %arg10[%c0_33, %c0_34] : memref<1x128xf32, #tpu.memory_space<vmem>>, vector<1x128xf32>
    %86 = vector.broadcast %85 : vector<1x128xf32> to vector<2x128xf32>
    %87 = arith.addf %84, %86 : vector<2x128xf32>
    %88 = arith.negf %87 : vector<2x128xf32>
    %89 = math.exp %88 : vector<2x128xf32>
    %cst_35 = arith.constant 1.000000e+00 : f32
    %90 = vector.broadcast %cst_35 : f32 to vector<2x128xf32>
    %91 = arith.addf %90, %89 : vector<2x128xf32>
    %92 = arith.divf %90, %91 : vector<2x128xf32>
    %93 = vector.shape_cast %92 : vector<2x128xf32> to vector<2x1x128xf32>
    %94 = vector.broadcast %93 : vector<2x1x128xf32> to vector<2x16x128xf32>
    %95 = arith.mulf %65, %94 : vector<2x16x128xf32>
    %96 = vector.shape_cast %95 : vector<2x16x128xf32> to vector<32x128xf32>
    %97 = arith.addf %96, %10 : vector<32x128xf32>
    %c0_36 = arith.constant 0 : index
    %c0_37 = arith.constant 0 : index
    %98 = vector.load %arg11[%c0_36, %c0_37] : memref<1x128xf32, #tpu.memory_space<vmem>>, vector<1x128xf32>
    %99 = vector.broadcast %98 : vector<1x128xf32> to vector<32x128xf32>
    %100 = arith.mulf %97, %99 : vector<32x128xf32>
    %c0_38 = arith.constant 0 : index
    %c0_39 = arith.constant 0 : index
    %101 = vector.load %arg12[%c0_38, %c0_39] : memref<1x128xf32, #tpu.memory_space<vmem>>, vector<1x128xf32>
    %102 = vector.broadcast %101 : vector<1x128xf32> to vector<32x128xf32>
    %103 = arith.addf %100, %102 : vector<32x128xf32>
    %cst_40 = arith.constant 0.000000e+00 : f32
    %104 = vector.broadcast %cst_40 : f32 to vector<32x128xf32>
    %105 = arith.maximumf %103, %104 : vector<32x128xf32>
    %106 = vector.shape_cast %105 : vector<32x128xf32> to vector<2x16x128xf32>
    %c0_41 = arith.constant 0 : index
    %c0_42 = arith.constant 0 : index
    %c0_43 = arith.constant 0 : index
    %107 = vector.load %arg13[%c0_41, %c0_42, %c0_43] : memref<2x16x128xf32, #tpu.memory_space<vmem>>, vector<2x16x128xf32>
    tpu.vector_store %arg13[%c0_41, %c0_42, %c0_43], %106 {strides = array<i32>} : memref<2x16x128xf32, #tpu.memory_space<vmem>>, vector<2x16x128xf32>,
    return
  }
  func.func @transform_0(%arg0: i32) -> (i32, i32, i32) {
    %c0_i32 = arith.constant 0 : i32
    %c0_i32_0 = arith.constant 0 : i32
    %c0_i32_1 = arith.constant 0 : i32
    return %arg0, %c0_i32, %c0_i32_0 : i32, i32, i32
  }
  func.func @transform_1(%arg0: i32) -> (i32, i32) {
    %c0_i32 = arith.constant 0 : i32
    %c0_i32_0 = arith.constant 0 : i32
    %c0_i32_1 = arith.constant 0 : i32
    return %c0_i32, %c0_i32_0 : i32, i32
  }
  func.func @transform_2(%arg0: i32) -> (i32, i32) {
    %c0_i32 = arith.constant 0 : i32
    %c0_i32_0 = arith.constant 0 : i32
    %c0_i32_1 = arith.constant 0 : i32
    return %c0_i32, %c0_i32_0 : i32, i32
  }
  func.func @transform_3(%arg0: i32) -> (i32, i32) {
    %c0_i32 = arith.constant 0 : i32
    %c0_i32_0 = arith.constant 0 : i32
    %c0_i32_1 = arith.constant 0 : i32
    return %c0_i32, %c0_i32_0 : i32, i32
  }
  func.func @transform_4(%arg0: i32) -> (i32, i32) {
    %c0_i32 = arith.constant 0 : i32
    %c0_i32_0 = arith.constant 0 : i32
    %c0_i32_1 = arith.constant 0 : i32
    return %c0_i32, %c0_i32_0 : i32, i32
  }
  func.func @transform_5(%arg0: i32) -> (i32, i32) {
    %c0_i32 = arith.constant 0 : i32
    %c0_i32_0 = arith.constant 0 : i32
    %c0_i32_1 = arith.constant 0 : i32
    return %c0_i32, %c0_i32_0 : i32, i32
  }
  func.func @transform_6(%arg0: i32) -> (i32, i32) {
    %c0_i32 = arith.constant 0 : i32
    %c0_i32_0 = arith.constant 0 : i32
    %c0_i32_1 = arith.constant 0 : i32
    return %c0_i32, %c0_i32_0 : i32, i32
  }
  func.func @transform_7(%arg0: i32) -> (i32, i32) {
    %c0_i32 = arith.constant 0 : i32
    %c0_i32_0 = arith.constant 0 : i32
    %c0_i32_1 = arith.constant 0 : i32
    return %c0_i32, %c0_i32_0 : i32, i32
  }
  func.func @transform_8(%arg0: i32) -> (i32, i32) {
    %c0_i32 = arith.constant 0 : i32
    %c0_i32_0 = arith.constant 0 : i32
    %c0_i32_1 = arith.constant 0 : i32
    return %c0_i32, %c0_i32_0 : i32, i32
  }
  func.func @transform_9(%arg0: i32) -> (i32, i32) {
    %c0_i32 = arith.constant 0 : i32
    %c0_i32_0 = arith.constant 0 : i32
    %c0_i32_1 = arith.constant 0 : i32
    return %c0_i32, %c0_i32_0 : i32, i32
  }
  func.func @transform_10(%arg0: i32) -> (i32, i32) {
    %c0_i32 = arith.constant 0 : i32
    %c0_i32_0 = arith.constant 0 : i32
    %c0_i32_1 = arith.constant 0 : i32
    return %c0_i32, %c0_i32_0 : i32, i32
  }
  func.func @transform_11(%arg0: i32) -> (i32, i32) {
    %c0_i32 = arith.constant 0 : i32
    %c0_i32_0 = arith.constant 0 : i32
    %c0_i32_1 = arith.constant 0 : i32
    return %c0_i32, %c0_i32_0 : i32, i32
  }
  func.func @transform_12(%arg0: i32) -> (i32, i32, i32) {
    %c0_i32 = arith.constant 0 : i32
    %c0_i32_0 = arith.constant 0 : i32
    %c0_i32_1 = arith.constant 0 : i32
    return %arg0, %c0_i32, %c0_i32_0 : i32, i32, i32
  }
}

</mosaic_0001>

<bundles_post_ra>
// kernel: tpu_custom_call.1
= control target key start
LH: loop header
LB: loop body
LE: loop exit
PB: predicated region body
PF: predicated region fallthrough
CT: control target
= control target key end

     0   :  { %s1716_s0 = inlined_call_operand.hbm [shape: f32[2,16,432], index: 0, kind: input, shape index: {}]   ;;  %s1717_s1 = inlined_call_operand.hbm [shape: f32[432,384], index: 1, kind: input, shape index: {}]   ;;  %s1718_s2 = inlined_call_operand.vmem [shape: f32[9,128], index: 2, kind: input, shape index: {}]   ;;  %s1719_s3 = inlined_call_operand.vmem [shape: f32[1,128], index: 3, kind: input, shape index: {}]   ;;  %s1720_s4 = inlined_call_operand.vmem [shape: f32[32,1], index: 4, kind: input, shape index: {}]   ;;  %s1721_s5 = inlined_call_operand.vmem [shape: f32[32,1], index: 5, kind: input, shape index: {}]   ;;  %s1722_s6 = inlined_call_operand.vmem [shape: f32[1,128], index: 6, kind: input, shape index: {}]   ;;  %s1723_s7 = inlined_call_operand.<no memory space> [shape: f32[1,1], index: 7, kind: input, shape index: {}]   ;;  %s1724_s8 = inlined_call_operand.vmem [shape: f32[1,128], index: 8, kind: input, shape index: {}]   ;;  %s1725_s9 = inlined_call_operand.vmem [shape: f32[1,128], index: 9, kind: input, shape index: {}]   ;;  %s1726_s10 = inlined_call_operand.vmem [shape: f32[1,128], index: 10, kind: input, shape index: {}]   ;;  %s1727_s11 = inlined_call_operand.vmem [shape: f32[1,128], index: 11, kind: input, shape index: {}]   ;;  %s1728_s12 = inlined_call_operand.hbm [shape: f32[2,16,128], index: 12, kind: output, shape index: {}]  }
   0x1   :  { %v17_v0 = vstv %s1723_s7 }
   0x2   :  { %18 = vst [vmem:[#allocation2] sm:$0x1] %v17_v0 }
   0x3   :  { %19 = vsyncpa [#allocation4], 0 }
   0x4   :  { %20 = vsyncpa [#allocation7], 0 }
   0x5   :  { %21 = vsyncpa [#allocation5], 0  ;;  %s1336_s23 = smov [#allocation3]   ;;  %s1264_s27 = scalar_lea.hbm %s1716_s0, 2048 }
   0x6   :  { %s27_s24 = sshll.u32 %s1336_s23, 4  ;;  %p1265_p0 = scmp.ne.s32.totalorder %s1716_s0, %s1264_s27  ;;  %s28_s24 = int_to_ptr.vmem [resolvable:$true] %s27_s24 }
   0x7   :  { %p1268_p1 = scmp.lt.u32.totalorder %s1264_s27, %s1716_s0 }
   0x9   :  { %p1270_p2 = pnand %p1268_p1, %p1265_p0 }
   0xb   :  { %1273 = shalt.err (!%p1270_p2)
}
   0xc   :  { %s1274_s7 = scalar_lea.vmem %s28_s24, 2048  ;;  %p1279_p4 = scmp.lt.s32.totalorder %s28_s24, %s28_s24 }
   0xd   :  { %p1275_p3 = scmp.ne.s32.totalorder %s28_s24, %s1274_s7  ;;  %p1280_p5 = scmp.lt.s32.totalorder %s1274_s7, %s1274_s7 }
   0xf   :  { %p1281_p6 = por %p1280_p5, %p1279_p4 }
  0x11   :  { %p1282_p7 = pnand %p1281_p6, %p1275_p3 }
  0x13   :  { %1285 = shalt.err (!%p1282_p7)
}
  0x14   :  { %s1337_s14 = smov 512   ;;  %s1338_s15 = smov 32  }
  0x15   :  { %33 = dma.hbm_to_vmem [thread:$0]  %s1716_s0, 2048, %s28_s24, [#allocation4], %s1337_s14, %s1337_s14, %s1338_s15  }
  0x16   :  { %s1339_s18 = smov [#allocation6]   ;;  %s1286_s22 = scalar_lea.hbm %s1717_s1, 20736 }
  0x17   :  { %s39_s19 = sshll.u32 %s1339_s18, 4  ;;  %p1287_p8 = scmp.ne.s32.totalorder %s1717_s1, %s1286_s22  ;;  %s40_s19 = int_to_ptr.vmem [resolvable:$true] %s39_s19 }
  0x18   :  { %p1290_p9 = scmp.lt.u32.totalorder %s1286_s22, %s1717_s1 }
  0x1a   :  { %p1292_p10 = pnand %p1290_p9, %p1287_p8 }
  0x1c   :  { %1295 = shalt.err (!%p1292_p10)
}
  0x1d   :  { %s1296_s28 = scalar_lea.vmem %s40_s19, 20736  ;;  %p1301_p12 = scmp.lt.s32.totalorder %s40_s19, %s40_s19 }
  0x1e   :  { %p1297_p11 = scmp.ne.s32.totalorder %s40_s19, %s1296_s28  ;;  %p1302_p13 = scmp.lt.s32.totalorder %s1296_s28, %s1296_s28 }
  0x20   :  { %p1303_p0 = por %p1302_p13, %p1301_p12 }
  0x22   :  { %p1304_p1 = pnand %p1303_p0, %p1297_p11 }
  0x24   :  { %1307 = shalt.err (!%p1304_p1)
}
  0x25   :  { %s1340_s0 = smov 384   ;;  %s1341_s24 = smov 24  }
  0x26   :  { %45 = dma.hbm_to_vmem [thread:$0]  %s1717_s1, 20736, %s40_s19, [#allocation7], %s1340_s0, %s1340_s0, %s1341_s24  }
  0x27   :  { %1330 = dma.done.wait [#allocation4], 2048  }
  0x28   :  { %1331 = vsyncadd [#allocation4], 4294965248 }
  0x29   :  { %1332 = dma.done.wait [#allocation7], 20736  }
  0x2a   :  { %1333 = vsyncadd [#allocation7], 4294946560  ;;  %v1342_v1 = vmov 0   ;;  %v89_v2 = vld [vmem:[#allocation6 + $0x8] sm:$0xff]  ;;  %v92_v3 = vld [vmem:[#allocation6 + $0x20] sm:$0xff]  ;;  %vm250_vm0 = vcmask 392192  }
  0x2b   :  { %1254 = vset.pattern.permute.xlu0 %v1342_v1  ;;  %1255 = vset.pattern.permute.xlu1 %v1342_v1  ;;  %v88_v4 = vld [vmem:[#allocation6] sm:$0xff]  ;;  %v1061_v5 = vpack.c.bf16 %v92_v3, %v89_v2  ;;  %v91_v6 = vld [vmem:[#allocation6 + $0x18] sm:$0xff]  ;;  %v98_v8 = vld [vmem:[#allocation6 + $0x50] sm:$0xff]  ;;  %s1344_s23 = smov 120   ;;  %vm872_vm3 = vcmask 1040384  }
  0x2c   :  { %v95_v7 = vld [vmem:[#allocation6 + $0x38] sm:$0xff]  ;;  %v1063_v9 = vpack.c.bf16 %v91_v6, %v88_v4  ;;  %v94_v11 = vld [vmem:[#allocation6 + $0x30] sm:$0xff]  ;;  %v97_v12 = vld [vmem:[#allocation6 + $0x48] sm:$0xff] }
  0x2d   :  { %v1065_v10 = vpack.c.bf16 %v98_v8, %v95_v7  ;;  %v101_v13 = vld [vmem:[#allocation6 + $0x68] sm:$0xff]  ;;  %1062 = vmatprep.subr.bf16.mxu0 %v1061_v5  ;;  %v104_v14 = vld [vmem:[#allocation6 + $0x80] sm:$0xff]  ;;  %v1067_v15 = vpack.c.bf16 %v97_v12, %v94_v11  ;;  %v103_v18 = vld [vmem:[#allocation6 + $0x78] sm:$0xff] }
  0x2e   :  { %1064 = vmatpush1.bf16.msra.mxu0 %v1063_v9  ;;  %v1069_v16 = vpack.c.bf16 %v104_v14, %v101_v13  ;;  %v100_v17 = vld [vmem:[#allocation6 + $0x60] sm:$0xff]  ;;  %v107_v19 = vld [vmem:[#allocation6 + $0x98] sm:$0xff]  ;;  %v110_v20 = vld [vmem:[#allocation6 + $0xb0] sm:$0xff] }
  0x2f   :  { %1066 = vmatprep.subr.bf16.mxu0 %v1065_v10  ;;  %v1071_v21 = vpack.c.bf16 %v103_v18, %v100_v17  ;;  %v1073_v22 = vpack.c.bf16 %v110_v20, %v107_v19  ;;  %v106_v23 = vld [vmem:[#allocation6 + $0x90] sm:$0xff]  ;;  %v109_v24 = vld [vmem:[#allocation6 + $0xa8] sm:$0xff]  ;;  %v116_v26 = vld [vmem:[#allocation6 + $0xe0] sm:$0xff] }
  0x30   :  { %v113_v25 = vld [vmem:[#allocation6 + $0xc8] sm:$0xff]  ;;  %v1075_v27 = vpack.c.bf16 %v109_v24, %v106_v23  ;;  %v112_v29 = vld [vmem:[#allocation6 + $0xc0] sm:$0xff]  ;;  %v115_v30 = vld [vmem:[#allocation6 + $0xd8] sm:$0xff] }
  0x31   :  { %v1077_v28 = vpack.c.bf16 %v116_v26, %v113_v25  ;;  %v119_v31 = vld [vmem:[#allocation6 + $0xf8] sm:$0xff]  ;;  %v122_v32 = vld [vmem:[#allocation6 + $0x110] sm:$0xff]  ;;  %v1079_v33 = vpack.c.bf16 %v115_v30, %v112_v29  ;;  %v121_v36 = vld [vmem:[#allocation6 + $0x108] sm:$0xff] }
  0x32   :  { %1068 = vmatpush1.bf16.msra.mxu0 %v1067_v15  ;;  %v1081_v34 = vpack.c.bf16 %v122_v32, %v119_v31  ;;  %v118_v35 = vld [vmem:[#allocation6 + $0xf0] sm:$0xff]  ;;  %v125_v37 = vld [vmem:[#allocation6 + $0x128] sm:$0xff]  ;;  %v128_v38 = vld [vmem:[#allocation6 + $0x140] sm:$0xff] }
  0x33   :  { %1070 = vmatprep.subr.bf16.mxu0 %v1069_v16  ;;  %v1083_v39 = vpack.c.bf16 %v121_v36, %v118_v35  ;;  %v1085_v40 = vpack.c.bf16 %v128_v38, %v125_v37  ;;  %v124_v41 = vld [vmem:[#allocation6 + $0x120] sm:$0xff]  ;;  %v127_v42 = vld [vmem:[#allocation6 + $0x138] sm:$0xff]  ;;  %v73_v43 = vld [vmem:[#allocation3 + $0x8] sm:$0xff] }
  0x34   :  { %v131_v44 = vld [vmem:[#allocation6 + $0x158] sm:$0xff]  ;;  %v134_v45 = vld [vmem:[#allocation6 + $0x170] sm:$0xff]  ;;  %327 = vmatprep.mubr.f32.mxu0 %v73_v43  ;;  %505 = vmatprep.mubr.f32.mxu1 %v73_v43  ;;  %v1087_v46 = vpack.c.bf16 %v127_v42, %v124_v41  ;;  %v133_v49 = vld [vmem:[#allocation6 + $0x168] sm:$0xff] }
  0x35   :  { %v1089_v47 = vpack.c.bf16 %v134_v45, %v131_v44  ;;  %v130_v48 = vld [vmem:[#allocation6 + $0x150] sm:$0xff]  ;;  %v137_v50 = vld [vmem:[#allocation6 + $0x188] sm:$0xff]  ;;  %v140_v51 = vld [vmem:[#allocation6 + $0x1a0] sm:$0xff] }
  0x36   :  { %1072 = vmatpush1.bf16.msra.mxu0 %v1071_v21  ;;  %v1091_v52 = vpack.c.bf16 %v133_v49, %v130_v48  ;;  %v1093_v53 = vpack.c.bf16 %v140_v51, %v137_v50  ;;  %v136_v54 = vld [vmem:[#allocation6 + $0x180] sm:$0xff]  ;;  %v139_v55 = vld [vmem:[#allocation6 + $0x198] sm:$0xff]  ;;  %v146_v57 = vld [vmem:[#allocation6 + $0x1d0] sm:$0xff] }
  0x37   :  { %1074 = vmatprep.subr.bf16.mxu0 %v1073_v22  ;;  %v143_v56 = vld [vmem:[#allocation6 + $0x1b8] sm:$0xff]  ;;  %v1095_v58 = vpack.c.bf16 %v139_v55, %v136_v54  ;;  %v142_v60 = vld [vmem:[#allocation6 + $0x1b0] sm:$0xff]  ;;  %v145_v61 = vld [vmem:[#allocation6 + $0x1c8] sm:$0xff] }
  0x38   :  { %v1097_v59 = vpack.c.bf16 %v146_v57, %v143_v56  ;;  %v149_v62 = vld [vmem:[#allocation6 + $0x1e8] sm:$0xff]  ;;  %v152_v63 = vld [vmem:[#allocation6 + $0x200] sm:$0xff]  ;;  %v1099_v0 = vpack.c.bf16 %v145_v61, %v142_v60  ;;  %v151_v3 = vld [vmem:[#allocation6 + $0x1f8] sm:$0xff] }
  0x39   :  { %v1101_v1 = vpack.c.bf16 %v152_v63, %v149_v62  ;;  %v148_v2 = vld [vmem:[#allocation6 + $0x1e0] sm:$0xff]  ;;  %v155_v4 = vld [vmem:[#allocation6 + $0x218] sm:$0xff]  ;;  %v158_v5 = vld [vmem:[#allocation6 + $0x230] sm:$0xff] }
  0x3a   :  { %1076 = vmatpush1.bf16.msra.mxu0 %v1075_v27  ;;  %v1103_v6 = vpack.c.bf16 %v151_v3, %v148_v2  ;;  %v154_v7 = vld [vmem:[#allocation6 + $0x210] sm:$0xff]  ;;  %v1105_v8 = vpack.c.bf16 %v158_v5, %v155_v4  ;;  %v157_v9 = vld [vmem:[#allocation6 + $0x228] sm:$0xff]  ;;  %v767_v10 = vld [vmem:[%s1720_s4] sm:$0xff] }
  0x3b   :  { %1078 = vmatprep.subr.bf16.mxu0 %v1077_v28  ;;  %v768_v11 = vld [vmem:[%s1720_s4 + $0x8] sm:$0xff]  ;;  %773 = vperm.xlu0 %1254, %v767_v10   ;;  %v770_v14 = vld [vmem:[%s1720_s4 + $0x18] sm:$0xff]  ;;  %v769_v15 = vld [vmem:[%s1720_s4 + $0x10] sm:$0xff]  ;;  %v1107_v16 = vpack.c.bf16 %v157_v9, %v154_v7  ;;  %s1343_s4 = smov 8  }
  0x3c   :  { %v161_v12 = vld [vmem:[#allocation6 + $0x248] sm:$0xff]  ;;  %v164_v13 = vld [vmem:[#allocation6 + $0x260] sm:$0xff]  ;;  %778 = vperm.xlu1 %1255, %v768_v11   ;;  %v163_v19 = vld [vmem:[#allocation6 + $0x258] sm:$0xff] }
  0x3d   :  { %v1109_v17 = vpack.c.bf16 %v164_v13, %v161_v12  ;;  %v160_v18 = vld [vmem:[#allocation6 + $0x240] sm:$0xff]  ;;  %v167_v20 = vld [vmem:[#allocation6 + $0x278] sm:$0xff]  ;;  %v170_v21 = vld [vmem:[#allocation6 + $0x290] sm:$0xff] }
  0x3e   :  { %1080 = vmatpush1.bf16.msra.mxu0 %v1079_v33  ;;  %v809_v22 = vld [vmem:[%s1721_s5 + $0x8] sm:$0xff]  ;;  %v808_v23 = vld [vmem:[%s1721_s5] sm:$0xff]  ;;  %v1111_v24 = vpack.c.bf16 %v163_v19, %v160_v18  ;;  %v1113_v25 = vpack.c.bf16 %v170_v21, %v167_v20  ;;  %v166_v26 = vld [vmem:[#allocation6 + $0x270] sm:$0xff] }
  0x3f   :  { %1082 = vmatprep.subr.bf16.mxu0 %v1081_v34  ;;  %788 = vperm.xlu0 %1254, %v770_v14   ;;  %v169_v27 = vld [vmem:[#allocation6 + $0x288] sm:$0xff]  ;;  %v176_v29 = vld [vmem:[#allocation6 + $0x2c0] sm:$0xff]  ;;  %v175_v33 = vld [vmem:[#allocation6 + $0x2b8] sm:$0xff] }
  0x40   :  { %783 = vperm.xlu1 %1255, %v769_v15   ;;  %v173_v28 = vld [vmem:[#allocation6 + $0x2a8] sm:$0xff]  ;;  %v1115_v30 = vpack.c.bf16 %v169_v27, %v166_v26  ;;  %v172_v32 = vld [vmem:[#allocation6 + $0x2a0] sm:$0xff]  ;;  %v179_v34 = vld [vmem:[#allocation6 + $0x2d8] sm:$0xff] }
  0x41   :  { %v1117_v31 = vpack.c.bf16 %v176_v29, %v173_v28  ;;  %v182_v35 = vld [vmem:[#allocation6 + $0x2f0] sm:$0xff]  ;;  %v1119_v36 = vpack.c.bf16 %v175_v33, %v172_v32  ;;  %v188_v41 = vld [vmem:[#allocation6 + $0x320] sm:$0xff]  ;;  %v187_v45 = vld [vmem:[#allocation6 + $0x318] sm:$0xff] }
  0x42   :  { %1084 = vmatpush1.bf16.msra.mxu0 %v1083_v39  ;;  %v1121_v37 = vpack.c.bf16 %v182_v35, %v179_v34  ;;  %v178_v38 = vld [vmem:[#allocation6 + $0x2d0] sm:$0xff]  ;;  %v181_v39 = vld [vmem:[#allocation6 + $0x2e8] sm:$0xff]  ;;  %v184_v44 = vld [vmem:[#allocation6 + $0x300] sm:$0xff] }
  0x43   :  { %1086 = vmatprep.subr.bf16.mxu0 %v1085_v40  ;;  %819 = vperm.xlu0 %1254, %v809_v22   ;;  %v185_v40 = vld [vmem:[#allocation6 + $0x308] sm:$0xff]  ;;  %v1123_v42 = vpack.c.bf16 %v181_v39, %v178_v38  ;;  %v1458_v48 = vld [vmem:[#allocation3] sm:$0xff]  ;;  %v1127_v49 = vpack.c.bf16 %v187_v45, %v184_v44  ;;  %v190_v51 = vld [vmem:[#allocation6 + $0x330] sm:$0xff] }
  0x44   :  { %814 = vperm.xlu1 %1255, %v808_v23   ;;  %v1125_v43 = vpack.c.bf16 %v188_v41, %v185_v40  ;;  %v197_v54 = vld [vmem:[#allocation6 + $0x368] sm:$0xff]  ;;  %v200_v55 = vld [vmem:[#allocation6 + $0x380] sm:$0xff]  ;;  %v199_v60 = vld [vmem:[#allocation6 + $0x378] sm:$0xff] }
  0x45   :  { %v1464_v57 = vld [vmem:[#allocation3 + $0x20] sm:$0xff]  ;;  %v1466_v61 = vld [vmem:[#allocation3 + $0x48] sm:$0xff]  ;;  %v203_v62 = vld [vmem:[#allocation6 + $0x398] sm:$0xff] }
  0x46   :  { %1088 = vmatpush1.bf16.msra.mxu0 %v1087_v46  ;;  %v191_v46 = vld [vmem:[#allocation6 + $0x338] sm:$0xff]  ;;  %v206_v63 = vld [vmem:[#allocation6 + $0x3b0] sm:$0xff]  ;;  %v205_v4 = vld [vmem:[#allocation6 + $0x3a8] sm:$0xff] }
  0x47   :  { %1090 = vmatprep.subr.bf16.mxu0 %v1089_v47  ;;  %v194_v47 = vld [vmem:[#allocation6 + $0x350] sm:$0xff]  ;;  %v1137_v2 = vpack.c.bf16 %v206_v63, %v203_v62  ;;  %v1472_v5 = vld [vmem:[#allocation3 + $0x68] sm:$0xff]  ;;  %v212_v7 = vld [vmem:[#allocation6 + $0x3e0] sm:$0xff] }
  0x48   :  { %v1129_v50 = vpack.c.bf16 %v194_v47, %v191_v46  ;;  %v202_v3 = vld [vmem:[#allocation6 + $0x390] sm:$0xff]  ;;  %v1476_v9 = vld [vmem:[#allocation3 + $0x60] sm:$0xff]  ;;  %v211_v12 = vld [vmem:[#allocation6 + $0x3d8] sm:$0xff] }
  0x49   :  { %v208_v11 = vld [vmem:[#allocation6 + $0x3c0] sm:$0xff]  ;;  %v1478_v13 = vld [vmem:[#allocation3 + $0x18] sm:$0xff]  ;;  %v218_v15 = vld [vmem:[#allocation6 + $0x410] sm:$0xff] }
  0x4a   :  { %1092 = vmatpush1.bf16.msra.mxu0 %v1091_v52  ;;  %v193_v52 = vld [vmem:[#allocation6 + $0x348] sm:$0xff]  ;;  %v215_v14 = vld [vmem:[#allocation6 + $0x3f8] sm:$0xff]  ;;  %v214_v18 = vld [vmem:[#allocation6 + $0x3f0] sm:$0xff] }
  0x4b   :  { %1094 = vmatprep.subr.bf16.mxu0 %v1093_v53  ;;  %v1460_v53 = vld [vmem:[#allocation3 + $0x28] sm:$0xff]  ;;  %v1131_v56 = vpack.c.bf16 %v193_v52, %v190_v51  ;;  %v224_v21 = vld [vmem:[#allocation6 + $0x440] sm:$0xff]  ;;  %v227_v26 = vld [vmem:[#allocation6 + $0x458] sm:$0xff] }
  0x4c   :  { %v217_v19 = vld [vmem:[#allocation6 + $0x408] sm:$0xff]  ;;  %v230_v27 = vld [vmem:[#allocation6 + $0x470] sm:$0xff]  ;;  %v236_v33 = vld [vmem:[#allocation6 + $0x4a0] sm:$0xff] }
  0x4d   :  { %v221_v20 = vld [vmem:[#allocation6 + $0x428] sm:$0xff]  ;;  %v1147_v22 = vpack.c.bf16 %v217_v19, %v214_v18  ;;  %v1153_v29 = vpack.c.bf16 %v230_v27, %v227_v26  ;;  %v239_v38 = vld [vmem:[#allocation6 + $0x4b8] sm:$0xff]  ;;  %v242_v39 = vld [vmem:[#allocation6 + $0x4d0] sm:$0xff] }
  0x4e   :  { %1096 = vmatpush1.bf16.msra.mxu0 %v1095_v58  ;;  %v1133_v58 = vpack.c.bf16 %v200_v55, %v197_v54  ;;  %v1149_v23 = vpack.c.bf16 %v224_v21, %v221_v20  ;;  %v233_v32 = vld [vmem:[#allocation6 + $0x488] sm:$0xff]  ;;  %v1161_v41 = vpack.c.bf16 %v242_v39, %v239_v38  ;;  %v248_v45 = vld [vmem:[#allocation6 + $0x500] sm:$0xff]  ;;  %v1483_v52 = vld [vmem:[#allocation3 + $0x10] sm:$0xff] }
  0x4f   :  { %1098 = vmatprep.subr.bf16.mxu0 %v1097_v59  ;;  %v196_v59 = vld [vmem:[#allocation6 + $0x360] sm:$0xff]  ;;  %v1157_v35 = vpack.c.bf16 %v236_v33, %v233_v32  ;;  %v245_v44 = vld [vmem:[#allocation6 + $0x4e8] sm:$0xff]  ;;  %v1485_v54 = vld [vmem:[#allocation3 + $0x38] sm:$0xff] }
  0x50   :  { %v1165_v47 = vpack.c.bf16 %v248_v45, %v245_v44  ;;  %v1490_v55 = vld [vmem:[#allocation3 + $0x30] sm:$0xff]  ;;  %v96_v45 = vld [vmem:[#allocation6 + $0x40] sm:$0xff] }
  0x51   :  { %v90_v39 = vld [vmem:[#allocation6 + $0x10] sm:$0xff] }
  0x52   :  { %1100 = vmatpush1.bf16.msra.mxu0 %v1099_v0  ;;  %v1135_v0 = vpack.c.bf16 %v199_v60, %v196_v59  ;;  %v1499_v59 = vld [vmem:[#allocation3 + $0x78] sm:$0xff]  ;;  %v1504_v60 = vld [vmem:[#allocation3 + $0x70] sm:$0xff] }
  0x53   :  { %1102 = vmatprep.subr.bf16.mxu0 %v1101_v1  ;;  %v1470_v1 = vld [vmem:[#allocation3 + $0x40] sm:$0xff] }
  0x56   :  { %1104 = vmatpush1.bf16.msra.mxu0 %v1103_v6  ;;  %v209_v6 = vld [vmem:[#allocation6 + $0x3c8] sm:$0xff] }
  0x57   :  { %1106 = vmatprep.subr.bf16.mxu0 %v1105_v8  ;;  %v1139_v8 = vpack.c.bf16 %v205_v4, %v202_v3  ;;  %v1141_v10 = vpack.c.bf16 %v212_v7, %v209_v6 }
  0x5a   :  { %1108 = vmatpush1.bf16.msra.mxu0 %v1107_v16  ;;  %v1143_v16 = vpack.c.bf16 %v211_v12, %v208_v11 }
  0x5b   :  { %1110 = vmatprep.subr.bf16.mxu0 %v1109_v17  ;;  %v1145_v17 = vpack.c.bf16 %v218_v15, %v215_v14 }
  0x5e   :  { %1112 = vmatpush1.bf16.msra.mxu0 %v1111_v24  ;;  %v220_v24 = vld [vmem:[#allocation6 + $0x420] sm:$0xff] }
  0x5f   :  { %1114 = vmatprep.subr.bf16.mxu0 %v1113_v25  ;;  %v223_v25 = vld [vmem:[#allocation6 + $0x438] sm:$0xff] }
  0x60   :  { %v1151_v28 = vpack.c.bf16 %v223_v25, %v220_v24 }
  0x62   :  { %1116 = vmatpush1.bf16.msra.mxu0 %v1115_v30  ;;  %v226_v30 = vld [vmem:[#allocation6 + $0x450] sm:$0xff] }
  0x63   :  { %1118 = vmatprep.subr.bf16.mxu0 %v1117_v31  ;;  %v229_v31 = vld [vmem:[#allocation6 + $0x468] sm:$0xff] }
  0x64   :  { %v1155_v34 = vpack.c.bf16 %v229_v31, %v226_v30 }
  0x66   :  { %1120 = vmatpush1.bf16.msra.mxu0 %v1119_v36  ;;  %v232_v36 = vld [vmem:[#allocation6 + $0x480] sm:$0xff] }
  0x67   :  { %1122 = vmatprep.subr.bf16.mxu0 %v1121_v37  ;;  %v235_v37 = vld [vmem:[#allocation6 + $0x498] sm:$0xff] }
  0x68   :  { %v1159_v40 = vpack.c.bf16 %v235_v37, %v232_v36  ;;  %v138_v36 = vld [vmem:[#allocation6 + $0x190] sm:$0xff]  ;;  %v141_v37 = vld [vmem:[#allocation6 + $0x1a8] sm:$0xff] }
  0x69   :  { %v1169_v38 = vpack.c.bf16 %v141_v37, %v138_v36  ;;  %v135_v37 = vld [vmem:[#allocation6 + $0x178] sm:$0xff] }
  0x6a   :  { %1124 = vmatpush1.bf16.msra.mxu0 %v1123_v42  ;;  %v238_v42 = vld [vmem:[#allocation6 + $0x4b0] sm:$0xff] }
  0x6b   :  { %1126 = vmatprep.subr.bf16.mxu0 %v1125_v43  ;;  %v241_v43 = vld [vmem:[#allocation6 + $0x4c8] sm:$0xff]  ;;  %1170 = vmatprep.subr.bf16.mxu1 %v1169_v38  ;;  %v186_v38 = vld [vmem:[#allocation6 + $0x310] sm:$0xff] }
  0x6c   :  { %v1163_v46 = vpack.c.bf16 %v241_v43, %v238_v42  ;;  %v144_v42 = vld [vmem:[#allocation6 + $0x1c0] sm:$0xff]  ;;  %v147_v43 = vld [vmem:[#allocation6 + $0x1d8] sm:$0xff] }
  0x6d   :  { %328 = vmatmul.mubr.f32.vlgmr.msra.gmra.mrb[0].mxu0 %v1458_v48  ;;  %v1173_v44 = vpack.c.bf16 %v147_v43, %v144_v42  ;;  %v1345_v42 = vmov 0.0|0.0   ;;  %v192_v43 = vld [vmem:[#allocation6 + $0x340] sm:$0xff] }
  0x6e   :  { %1128 = vmatpush1.bf16.msra.mxu0 %v1127_v49  ;;  %333 = vmatprep.mubr.f32.mxu0 %v1460_v53  ;;  %v244_v49 = vld [vmem:[#allocation6 + $0x4e0] sm:$0xff] }
  0x6f   :  { %1130 = vmatprep.subr.bf16.mxu0 %v1129_v50  ;;  %v247_v50 = vld [vmem:[#allocation6 + $0x4f8] sm:$0xff] }
  0x70   :  { %v1167_v51 = vpack.c.bf16 %v247_v50, %v244_v49  ;;  %v150_v49 = vld [vmem:[#allocation6 + $0x1f0] sm:$0xff]  ;;  %v153_v50 = vld [vmem:[#allocation6 + $0x208] sm:$0xff] }
  0x71   :  { %334 = vmatmul.mubr.f32.gmra.mrb[2].mxu0 %v1464_v57 }
  0x72   :  { %1132 = vmatpush1.bf16.msra.mxu0 %v1131_v56  ;;  %339 = vmatprep.mubr.f32.mxu0 %v1466_v61  ;;  %v1492_v56 = vld [vmem:[#allocation3 + $0x58] sm:$0xff] }
  0x73   :  { %1134 = vmatprep.subr.bf16.mxu0 %v1133_v58  ;;  %v1497_v58 = vld [vmem:[#allocation3 + $0x50] sm:$0xff] }
  0x75   :  { %340 = vmatmul.mubr.f32.gmra.mrb[4].mxu0 %v1470_v1 }
  0x76   :  { %1136 = vmatpush1.bf16.msra.mxu0 %v1135_v0  ;;  %345 = vmatprep.mubr.f32.mxu0 %v1472_v5 }
  0x77   :  { %1138 = vmatprep.subr.bf16.mxu0 %v1137_v2 }
  0x79   :  { %346 = vmatmul.mubr.f32.gmra.mrb[6].mxu0 %v1476_v9 }
  0x7a   :  { %1140 = vmatpush1.bf16.msra.mxu0 %v1139_v8  ;;  %993 = vmatprep.mubr.msk.f32.mxu0 %vm250_vm0, %v1478_v13 }
  0x7b   :  { %1142 = vmatprep.subr.bf16.mxu0 %v1141_v10 }
  0x7e   :  { %1144 = vmatpush1.bf16.msra.mxu0 %v1143_v16 }
  0x7f   :  { %1146 = vmatprep.subr.bf16.mxu0 %v1145_v17 }
  0x82   :  { %1148 = vmatpush1.bf16.msra.mxu0 %v1147_v22 }
  0x83   :  { %1150 = vmatprep.subr.bf16.mxu0 %v1149_v23 }
  0x86   :  { %1152 = vmatpush1.bf16.msra.mxu0 %v1151_v28 }
  0x87   :  { %1154 = vmatprep.subr.bf16.mxu0 %v1153_v29 }
  0x8a   :  { %1156 = vmatpush1.bf16.msra.mxu0 %v1155_v34  ;;  %v811_v34 = vld [vmem:[%s1721_s5 + $0x18] sm:$0xff] }
  0x8b   :  { %1158 = vmatprep.subr.bf16.mxu0 %v1157_v35  ;;  %v810_v35 = vld [vmem:[%s1721_s5 + $0x10] sm:$0xff] }
  0x8e   :  { %1160 = vmatpush1.bf16.msra.mxu0 %v1159_v40  ;;  %v93_v40 = vld [vmem:[#allocation6 + $0x28] sm:$0xff] }
  0x8f   :  { %1162 = vmatprep.subr.bf16.mxu0 %v1161_v41  ;;  %v1171_v41 = vpack.c.bf16 %v93_v40, %v90_v39  ;;  %v189_v39 = vld [vmem:[#allocation6 + $0x328] sm:$0xff] }
  0x91   :  { %1172 = vmatpush3.bf16.msra.mxu1 %v1171_v41  ;;  %v1202_v41 = vpack.c.bf16 %v189_v39, %v186_v38  ;;  %v1004_v39 = vld [vmem:[%s1718_s2 + $0x3] ss:$0 sm:$0xff] }
  0x92   :  { %1164 = vmatpush1.bf16.msra.mxu0 %v1163_v46  ;;  %v99_v46 = vld [vmem:[#allocation6 + $0x58] sm:$0xff]  ;;  %1174 = vmatprep.subr.bf16.mxu1 %v1173_v44 }
  0x93   :  { %1166 = vmatprep.subr.bf16.mxu0 %v1165_v47  ;;  %v1175_v47 = vpack.c.bf16 %v99_v46, %v96_v45  ;;  %v195_v44 = vld [vmem:[#allocation6 + $0x358] sm:$0xff]  ;;  %v198_v46 = vld [vmem:[#allocation6 + $0x370] sm:$0xff] }
  0x94   :  { %v1205_v45 = vpack.c.bf16 %v195_v44, %v192_v43 }
  0x95   :  { %1176 = vmatpush3.bf16.msra.mxu1 %v1175_v47  ;;  %v201_v47 = vld [vmem:[#allocation6 + $0x388] sm:$0xff] }
  0x96   :  { %1168 = vmatpush1.bf16.msra.mxu0 %v1167_v51  ;;  %v1177_v51 = vpack.c.bf16 %v153_v50, %v150_v49  ;;  %v1208_v49 = vpack.c.bf16 %v201_v47, %v198_v46  ;;  %v204_v50 = vld [vmem:[#allocation6 + $0x3a0] sm:$0xff] }
  0x98   :  { %1178 = vmatprep.subr.bf16.mxu1 %v1177_v51  ;;  %v207_v51 = vld [vmem:[#allocation6 + $0x3b8] sm:$0xff] }
  0x99   :  { %417 = vmatmul.mubr.f32.vlgmr.msra.gmra.mrb[0].mxu0 %v1483_v52 }
  0x9a   :  { %994 = vmatprep.mubr.msk.f32.mxu0 %vm250_vm0, %v1485_v54 }
  0x9d   :  { %423 = vmatmul.mubr.f32.gmra.mrb[2].mxu0 %v1490_v55 }
  0x9e   :  { %995 = vmatprep.mubr.msk.f32.mxu0 %vm250_vm0, %v1492_v56 }
  0xa1   :  { %429 = vmatmul.mubr.f32.gmra.mrb[4].mxu0 %v1497_v58 }
  0xa2   :  { %996 = vmatprep.mubr.msk.f32.mxu0 %vm250_vm0, %v1499_v59 }
  0xa5   :  { %435 = vmatmul.mubr.f32.gmra.mrb[6].mxu0 %v1504_v60 }
 0x16c   :  { %v418_v62 = vpop.f32.mrb[0].mxu0 }
 0x16d   :  { %v611_v63 = vmax.f32 %v418_v62, 0.0  ;;  %v420_v0 = vpop.f32.mrb[1].mxu0  ;;  %v102_v62 = vld [vmem:[#allocation6 + $0x70] sm:$0xff] }
 0x16e   :  { %v615_v2 = vmax.f32 %v420_v0, 0.0 }
 0x170   :  { %v619_v3 = vsub.f32 %v611_v63, %v615_v2  ;;  %v424_v4 = vpop.f32.mrb[2].mxu0 }
 0x171   :  { %v612_v6 = vmax.f32 %v424_v4, 0.0  ;;  %v426_v7 = vpop.f32.mrb[3].mxu0 }
 0x172   :  { %v623_v8 = vand.u32 2147483647, %v619_v3  ;;  %v616_v10 = vmax.f32 %v426_v7, 0.0  ;;  %v159_v3 = vld [vmem:[#allocation6 + $0x238] sm:$0xff] }
 0x173   :  { %v111_v7 = vld [vmem:[#allocation6 + $0xb8] sm:$0xff] }
 0x174   :  { %v627_v11 = vadd.f32 %v623_v8, %v611_v63  ;;  %v620_v12 = vsub.f32 %v612_v6, %v616_v10  ;;  %v430_v14 = vpop.f32.mrb[4].mxu0  ;;  %v105_v63 = vld [vmem:[#allocation6 + $0x88] sm:$0xff]  ;;  %v162_v8 = vld [vmem:[#allocation6 + $0x250] sm:$0xff] }
 0x175   :  { %v613_v15 = vmax.f32 %v430_v14, 0.0  ;;  %v432_v16 = vpop.f32.mrb[5].mxu0  ;;  %v1179_v0 = vpack.c.bf16 %v105_v63, %v102_v62  ;;  %v117_v14 = vld [vmem:[#allocation6 + $0xe8] sm:$0xff]  ;;  %v219_v63 = vld [vmem:[#allocation6 + $0x418] sm:$0xff] }
 0x176   :  { %v1507_v17 = vadd.f32 %v627_v11, %v615_v2  ;;  %v624_v18 = vand.u32 2147483647, %v620_v12  ;;  %v617_v19 = vmax.f32 %v432_v16, 0.0  ;;  %v156_v2 = vld [vmem:[#allocation6 + $0x220] sm:$0xff]  ;;  %v165_v11 = vld [vmem:[#allocation6 + $0x268] sm:$0xff]  ;;  %v114_v12 = vld [vmem:[#allocation6 + $0xd0] sm:$0xff] }
 0x177   :  { %1180 = vmatpush3.bf16.msra.mxu1 %v1179_v0  ;;  %v1181_v4 = vpack.c.bf16 %v159_v3, %v156_v2  ;;  %v1187_v16 = vpack.c.bf16 %v117_v14, %v114_v12  ;;  %v213_v62 = vld [vmem:[#allocation6 + $0x3e8] sm:$0xff]  ;;  %v228_v3 = vld [vmem:[#allocation6 + $0x460] sm:$0xff]  ;;  %v246_v12 = vld [vmem:[#allocation6 + $0x4f0] sm:$0xff] }
 0x178   :  { %v628_v20 = vadd.f32 %v624_v18, %v612_v6  ;;  %v621_v21 = vsub.f32 %v613_v15, %v617_v19  ;;  %635 = vrot.lane.b32.xlu0 %v1507_v17, %s1343_s4  ;;  %v436_v22 = vpop.f32.mrb[6].mxu0  ;;  %v108_v6 = vld [vmem:[#allocation6 + $0xa0] sm:$0xff]  ;;  %v225_v2 = vld [vmem:[#allocation6 + $0x448] sm:$0xff] }
 0x179   :  { %v614_v23 = vmax.f32 %v436_v22, 0.0  ;;  %v438_v24 = vpop.f32.mrb[7].mxu0  ;;  %1182 = vmatprep.subr.bf16.mxu1 %v1181_v4  ;;  %v168_v18 = vld [vmem:[#allocation6 + $0x280] sm:$0xff]  ;;  %v123_v22 = vld [vmem:[#allocation6 + $0x118] sm:$0xff]  ;;  %v249_v14 = vld [vmem:[#allocation6 + $0x508] sm:$0xff] }
 0x17a   :  { %v1511_v25 = vadd.f32 %v628_v20, %v616_v10  ;;  %v625_v26 = vand.u32 2147483647, %v621_v21  ;;  %v618_v27 = vmax.f32 %v438_v24, 0.0  ;;  %v1183_v10 = vpack.c.bf16 %v111_v7, %v108_v6  ;;  %v120_v20 = vld [vmem:[#allocation6 + $0x100] sm:$0xff]  ;;  %v177_v24 = vld [vmem:[#allocation6 + $0x2c8] sm:$0xff]  ;;  %v231_v4 = vld [vmem:[#allocation6 + $0x478] sm:$0xff] }
 0x17b   :  { %v234_v6 = vld [vmem:[#allocation6 + $0x490] sm:$0xff]  ;;  %v237_v7 = vld [vmem:[#allocation6 + $0x4a8] sm:$0xff] }
 0x17c   :  { %v629_v28 = vadd.f32 %v625_v26, %v613_v15  ;;  %v622_v29 = vsub.f32 %v614_v23, %v618_v27  ;;  %643 = vrot.lane.b32.xlu0 %v1507_v17, %s1344_s23  ;;  %645 = vrot.lane.b32.xlu1 %v1511_v25, %s1344_s23  ;;  %v1185_v15 = vpack.c.bf16 %v165_v11, %v162_v8  ;;  %v240_v8 = vld [vmem:[#allocation6 + $0x4c0] sm:$0xff] }
 0x17d   :  { %1184 = vmatpush3.bf16.msra.mxu1 %v1183_v10  ;;  %v1191_v26 = vpack.c.bf16 %v123_v22, %v120_v20  ;;  %v243_v10 = vld [vmem:[#allocation6 + $0x4d8] sm:$0xff]  ;;  %v1008_v22 = vld [vmem:[%s1718_s2 + $0x7] ss:$0 sm:$0xff] }
 0x17e   :  { %v1515_v30 = vadd.f32 %v629_v28, %v617_v19  ;;  %v626_v31 = vand.u32 2147483647, %v622_v29  ;;  %1186 = vmatprep.subr.bf16.mxu1 %v1185_v15  ;;  %v171_v19 = vld [vmem:[#allocation6 + $0x298] sm:$0xff]  ;;  %v126_v28 = vld [vmem:[#allocation6 + $0x130] sm:$0xff]  ;;  %v129_v29 = vld [vmem:[#allocation6 + $0x148] sm:$0xff]  ;;  %v1229_v11 = vpack.c.bf16 %v243_v10, %v240_v8  ;;  %v1232_v15 = vpack.c.bf16 %v249_v14, %v246_v12 }
 0x17f   :  { %v1189_v21 = vpack.c.bf16 %v171_v19, %v168_v18  ;;  %v1547_v18 = vpop.permute.xlu1 %778  ;;  %v736_v43 = vmul.f32 %v1008_v22, %v1511_v25 }
 0x180   :  { %v630_v32 = vadd.f32 %v626_v31, %v614_v23  ;;  %637 = vrot.lane.b32.xlu0 %v1511_v25, %s1343_s4  ;;  %639 = vrot.lane.b32.xlu1 %v1515_v30, %s1343_s4  ;;  %v174_v23 = vld [vmem:[#allocation6 + $0x2b0] sm:$0xff]  ;;  %v1195_v31 = vpack.c.bf16 %v129_v29, %v126_v28  ;;  %v737_v46 = vmul.f32 %v1008_v22, %v1515_v30 }
 0x181   :  { %1188 = vmatpush3.bf16.msra.mxu1 %v1187_v16  ;;  %v1542_v16 = vpop.permute.xlu0 %773 }
 0x182   :  { %v1521_v33 = vadd.f32 %v630_v32, %v618_v27  ;;  %v1193_v27 = vpack.c.bf16 %v177_v24, %v174_v23  ;;  %1190 = vmatprep.subr.bf16.mxu1 %v1189_v21  ;;  %v180_v32 = vld [vmem:[#allocation6 + $0x2e0] sm:$0xff]  ;;  %v760_v21 = vlaneseq }
 0x183   :  { %v1557_v20 = vpop.permute.xlu1 %783 }
 0x184   :  { %647 = vrot.lane.b32.xlu0 %v1515_v30, %s1344_s23  ;;  %641 = vrot.lane.b32.xlu1 %v1521_v33, %s1343_s4  ;;  %v1592_v28 = vshrl.u32 %v760_v21, 7 }
 0x185   :  { %1192 = vmatpush3.bf16.msra.mxu1 %v1191_v26  ;;  %v1552_v19 = vpop.permute.xlu0 %788  ;;  %v1585_v26 = vld [vmem:[%s1718_s2 + $0x2] ss:$0 sm:$0xff] }
 0x186   :  { %1194 = vmatprep.subr.bf16.mxu1 %v1193_v27  ;;  %v1590_v27 = vld [vmem:[%s1718_s2 + $0x8] ss:$0 sm:$0xff]  ;;  %vm762_vm1 = vcmp.lt.s32.totalorder %v1592_v28, 1  ;;  %vm803_vm2 = vcmp.lt.s32.totalorder %v1592_v28, 7 }
 0x188   :  { %829 = vperm.xlu0 %1254, %v811_v34   ;;  %649 = vrot.lane.b32.xlu1 %v1521_v33, %s1344_s23  ;;  %v183_v34 = vld [vmem:[#allocation6 + $0x2f8] sm:$0xff] }
 0x189   :  { %1196 = vmatpush3.bf16.msra.mxu1 %v1195_v31  ;;  %v1197_v36 = vpack.c.bf16 %v183_v34, %v180_v32  ;;  %v735_v31 = vmul.f32 %v1008_v22, %v1507_v17 }
 0x18b   :  { %1198 = vmatprep.subr.bf16.mxu1 %v1197_v36 }
 0x18c   :  { %824 = vperm.xlu1 %1255, %v810_v35   ;;  %v132_v35 = vld [vmem:[#allocation6 + $0x160] sm:$0xff] }
 0x18d   :  { %v1199_v40 = vpack.c.bf16 %v135_v37, %v132_v35 }
 0x18f   :  { %1200 = vmatpush3.bf16.msra.mxu1 %v1199_v40 }
 0x190   :  { %1201 = vmatprep.subr.bf16.mxu1 %v1345_v42 }
 0x192   :  { %506 = vmatmul.mubr.f32.vlgmr.msra.gmra.mrb[0].mxu1 %v1458_v48  ;;  %v1211_v48 = vpack.c.bf16 %v207_v51, %v204_v50 }
 0x193   :  { %1203 = vmatpush1.bf16.msra.mxu1 %v1202_v41  ;;  %510 = vmatprep.mubr.f32.mxu1 %v1460_v53  ;;  %v210_v53 = vld [vmem:[#allocation6 + $0x3d0] sm:$0xff] }
 0x194   :  { %1204 = vmatprep.subr.bf16.mxu1 %v1345_v42 }
 0x196   :  { %511 = vmatmul.mubr.f32.gmra.mrb[2].mxu1 %v1464_v57  ;;  %v1214_v57 = vpack.c.bf16 %v213_v62, %v210_v53  ;;  %v738_v53 = vmul.f32 %v1008_v22, %v1521_v33 }
 0x197   :  { %1206 = vmatpush1.bf16.msra.mxu1 %v1205_v45  ;;  %515 = vmatprep.mubr.f32.mxu1 %v1466_v61  ;;  %v216_v61 = vld [vmem:[#allocation6 + $0x400] sm:$0xff] }
 0x198   :  { %1207 = vmatprep.subr.bf16.mxu1 %v1345_v42  ;;  %v1217_v0 = vpack.c.bf16 %v219_v63, %v216_v61 }
 0x19a   :  { %516 = vmatmul.mubr.f32.gmra.mrb[4].mxu1 %v1470_v1  ;;  %v222_v1 = vld [vmem:[#allocation6 + $0x430] sm:$0xff] }
 0x19b   :  { %1209 = vmatpush1.bf16.msra.mxu1 %v1208_v49  ;;  %520 = vmatprep.mubr.f32.mxu1 %v1472_v5  ;;  %v1220_v5 = vpack.c.bf16 %v225_v2, %v222_v1 }
 0x19c   :  { %1210 = vmatprep.subr.bf16.mxu1 %v1345_v42 }
 0x19e   :  { %521 = vmatmul.mubr.f32.gmra.mrb[6].mxu1 %v1476_v9  ;;  %v1223_v9 = vpack.c.bf16 %v231_v4, %v228_v3 }
 0x19f   :  { %1212 = vmatpush1.bf16.msra.mxu1 %v1211_v48  ;;  %997 = vmatprep.mubr.msk.f32.mxu1 %vm250_vm0, %v1478_v13  ;;  %v1226_v13 = vpack.c.bf16 %v237_v7, %v234_v6 }
 0x1a0   :  { %1213 = vmatprep.subr.bf16.mxu1 %v1345_v42 }
 0x1a3   :  { %1215 = vmatpush1.bf16.msra.mxu1 %v1214_v57 }
 0x1a4   :  { %1216 = vmatprep.subr.bf16.mxu1 %v1345_v42 }
 0x1a7   :  { %1218 = vmatpush1.bf16.msra.mxu1 %v1217_v0 }
 0x1a8   :  { %1219 = vmatprep.subr.bf16.mxu1 %v1345_v42 }
 0x1ab   :  { %1221 = vmatpush1.bf16.msra.mxu1 %v1220_v5 }
 0x1ac   :  { %1222 = vmatprep.subr.bf16.mxu1 %v1345_v42 }
 0x1af   :  { %1224 = vmatpush1.bf16.msra.mxu1 %v1223_v9 }
 0x1b0   :  { %1225 = vmatprep.subr.bf16.mxu1 %v1345_v42 }
 0x1b3   :  { %1227 = vmatpush1.bf16.msra.mxu1 %v1226_v13 }
 0x1b4   :  { %1228 = vmatprep.subr.bf16.mxu1 %v1345_v42 }
 0x1b7   :  { %1230 = vmatpush1.bf16.msra.mxu1 %v1229_v11 }
 0x1b8   :  { %1231 = vmatprep.subr.bf16.mxu1 %v1345_v42 }
 0x1bb   :  { %1233 = vmatpush1.bf16.msra.mxu1 %v1232_v15 }
 0x1be   :  { %591 = vmatmul.mubr.f32.vlgmr.msra.gmra.mrb[8].mxu1 %v1483_v52  ;;  %v1559_v52 = vpop.permute.xlu0 %819 }
 0x1bf   :  { %998 = vmatprep.mubr.msk.f32.mxu1 %vm250_vm0, %v1485_v54  ;;  %v1562_v54 = vpop.permute.xlu1 %814 }
 0x1c2   :  { %596 = vmatmul.mubr.f32.gmra.mrb[10].mxu1 %v1490_v55  ;;  %v1001_v55 = vld [vmem:[%s1718_s2] ss:$0 sm:$0xff] }
 0x1c3   :  { %999 = vmatprep.mubr.msk.f32.mxu1 %vm250_vm0, %v1492_v56  ;;  %v1570_v56 = vld [vmem:[%s1718_s2 + $0x6] ss:$0 sm:$0xff] }
 0x1c6   :  { %601 = vmatmul.mubr.f32.gmra.mrb[12].mxu1 %v1497_v58 }
 0x1c7   :  { %1000 = vmatprep.mubr.msk.f32.mxu1 %vm250_vm0, %v1499_v59  ;;  %v1002_v59 = vld [vmem:[%s1718_s2 + $0x1] ss:$0 sm:$0xff] }
 0x1c8   :  { %v665_v29 = vmul.f32 %v1002_v59, %v1507_v17  ;;  %v666_v38 = vmul.f32 %v1002_v59, %v1511_v25  ;;  %v667_v44 = vmul.f32 %v1002_v59, %v1515_v30  ;;  %v668_v47 = vmul.f32 %v1002_v59, %v1521_v33 }
 0x1ca   :  { %606 = vmatmul.mubr.f32.gmra.mrb[14].mxu1 %v1504_v60  ;;  %v1005_v60 = vld [vmem:[%s1718_s2 + $0x4] ss:$0 sm:$0xff] }
 0x1cb   :  { %v1597_v35 = vmul.f32 %v1005_v60, %v1507_v17  ;;  %v701_v42 = vmul.f32 %v1005_v60, %v1511_v25  ;;  %v1006_v17 = vld [vmem:[%s1718_s2 + $0x5] ss:$0 sm:$0xff]  ;;  %v702_v45 = vmul.f32 %v1005_v60, %v1515_v30  ;;  %v703_v48 = vmul.f32 %v1005_v60, %v1521_v33 }
 0x1ea   :  { %v636_v58 = vpop.permute.xlu0 %635 }
 0x1eb   :  { %v656_v23 = vmul.f32 %v1001_v55, %v636_v58  ;;  %v726_v24 = vmul.f32 %v1570_v56, %v636_v58  ;;  %v691_v62 = vmul.f32 %v1004_v39, %v636_v58 }
 0x1ed   :  { %v669_v40 = vadd.f32 %v665_v29, %v656_v23  ;;  %v739_v41 = vadd.f32 %v735_v31, %v726_v24 }
 0x1ee   :  { %v644_v32 = vpop.permute.xlu0 %643  ;;  %v646_v34 = vpop.permute.xlu1 %645 }
 0x1ef   :  { %v678_v36 = vmul.f32 %v1585_v26, %v644_v32  ;;  %v748_v37 = vmul.f32 %v1590_v27, %v644_v32  ;;  %v713_v30 = vmul.f32 %v1006_v17, %v644_v32  ;;  %v679_v5 = vmul.f32 %v1585_v26, %v646_v34 }
 0x1f0   :  { %v749_v3 = vmul.f32 %v1590_v27, %v646_v34  ;;  %v714_v7 = vmul.f32 %v1006_v17, %v646_v34 }
 0x1f1   :  { %v1616_v49 = vadd.f32 %v678_v36, %v669_v40  ;;  %v1618_v50 = vadd.f32 %v748_v37, %v739_v41 }
 0x1f2   :  { %v638_v51 = vpop.permute.xlu0 %637  ;;  %v640_v25 = vpop.permute.xlu1 %639 }
 0x1f3   :  { %v657_v57 = vmul.f32 %v1001_v55, %v638_v51  ;;  %v692_v61 = vmul.f32 %v1004_v39, %v638_v51  ;;  %v727_v63 = vmul.f32 %v1570_v56, %v638_v51  ;;  %v658_v0 = vmul.f32 %v1001_v55, %v640_v25 }
 0x1f4   :  { %v693_v1 = vmul.f32 %v1004_v39, %v640_v25  ;;  %v728_v2 = vmul.f32 %v1570_v56, %v640_v25  ;;  %v756_v6 = vrot.slane %v1616_v49, 7  ;;  %v799_v10 = vrot.slane %v1618_v50, 1 }
 0x1f5   :  { %v670_v4 = vadd.f32 %v666_v38, %v657_v57  ;;  %v740_v9 = vadd.f32 %v736_v43, %v727_v63  ;;  %v705_v33 = vadd.f32 %v701_v42, %v692_v61  ;;  %v671_v14 = vadd.f32 %v667_v44, %v658_v0 }
 0x1f6   :  { %v648_v13 = vpop.permute.xlu0 %647  ;;  %v642_v8 = vpop.permute.xlu1 %641  ;;  %v706_v21 = vadd.f32 %v702_v45, %v693_v1  ;;  %v741_v58 = vadd.f32 %v737_v46, %v728_v2 }
 0x1f7   :  { %v683_v11 = vadd.f32 %v679_v5, %v670_v4  ;;  %v753_v12 = vadd.f32 %v749_v3, %v740_v9  ;;  %v680_v15 = vmul.f32 %v1585_v26, %v648_v13  ;;  %v750_v59 = vmul.f32 %v1590_v27, %v648_v13 }
 0x1f8   :  { %v659_v60 = vmul.f32 %v1001_v55, %v642_v8  ;;  %v729_v29 = vmul.f32 %v1570_v56, %v642_v8  ;;  %v718_v31 = vadd.f32 %v714_v7, %v705_v33  ;;  %v715_v32 = vmul.f32 %v1006_v17, %v648_v13 }
 0x1f9   :  { %v757_v22 = vrot.slane %v683_v11, 7  ;;  %v800_v23 = vrot.slane %v753_v12, 1  ;;  %v684_v24 = vadd.f32 %v680_v15, %v671_v14  ;;  %v754_v34 = vadd.f32 %v750_v59, %v741_v58 }
 0x1fa   :  { %v694_v36 = vmul.f32 %v1004_v39, %v642_v8  ;;  %v650_v37 = vpop.permute.xlu1 %649  ;;  %v672_v41 = vadd.f32 %v668_v47, %v659_v60  ;;  %v742_v55 = vadd.f32 %v738_v53, %v729_v29  ;;  %v719_v51 = vadd.f32 %v715_v32, %v706_v21  ;;  %v869_v32 = vld [vmem:[%s1722_s6] sm:$0x1] }
 0x1fb   :  { %v765_v38 = vsel %vm762_vm1, %v756_v6, %v757_v22  ;;  %v758_v40 = vrot.slane %v684_v24, 7  ;;  %v681_v42 = vmul.f32 %v1585_v26, %v650_v37  ;;  %v751_v44 = vmul.f32 %v1590_v27, %v650_v37 }
 0x1fc   :  { %v792_v43 = vmul.f32 %v1547_v18, %v765_v38  ;;  %v806_v56 = vsel %vm803_vm2, %v799_v10, %v800_v23  ;;  %v716_v46 = vmul.f32 %v1006_v17, %v650_v37  ;;  %v801_v49 = vrot.slane %v754_v34, 1 }
 0x1fd   :  { %v685_v45 = vadd.f32 %v681_v42, %v672_v41  ;;  %v764_v39 = vsel %vm762_vm1, %v757_v22, %v758_v40  ;;  %v755_v25 = vadd.f32 %v751_v44, %v742_v55  ;;  %v704_v26 = vadd.f32 %v1597_v35, %v691_v62 }
 0x1fe   :  { %v796_v50 = vadd.f32 %v792_v43, %v718_v31  ;;  %v793_v47 = vmul.f32 %v1557_v20, %v764_v39  ;;  %v707_v18 = vadd.f32 %v703_v48, %v694_v36  ;;  %v805_v27 = vsel %vm803_vm2, %v800_v23, %v801_v49 }
 0x1ff   :  { %v759_v53 = vrot.slane %v685_v45, 7  ;;  %v802_v57 = vrot.slane %v755_v25, 1  ;;  %v833_v17 = vmul.f32 %v1559_v52, %v805_v27  ;;  %v717_v63 = vadd.f32 %v713_v30, %v704_v26  ;;  %v1010_v52 = vld [vmem:[%s1719_s3] ss:$0 sm:$0xff] }
 0x200   :  { %v797_v61 = vadd.f32 %v793_v47, %v719_v51  ;;  %v720_v0 = vadd.f32 %v716_v46, %v707_v18  ;;  %v832_v3 = vmul.f32 %v1562_v54, %v806_v56  ;;  %v1011_v56 = vld [vmem:[#allocation2] ss:$0 sm:$0xff] }
 0x201   :  { %v766_v1 = vsel %vm762_vm1, %v759_v53, %v756_v6  ;;  %v763_v2 = vsel %vm762_vm1, %v758_v40, %v759_v53  ;;  %v807_v48 = vsel %vm803_vm2, %v802_v57, %v799_v10  ;;  %v837_v62 = vadd.f32 %v833_v17, %v796_v50 }
 0x202   :  { %v791_v20 = vmul.f32 %v1542_v16, %v766_v1  ;;  %v794_v35 = vmul.f32 %v1552_v19, %v763_v2  ;;  %v804_v30 = vsel %vm803_vm2, %v801_v49, %v802_v57 }
 0x203   :  { %v1659_v6 = vadd.f32 %v1010_v52, %v837_v62 }
 0x204   :  { %v795_v5 = vadd.f32 %v791_v20, %v717_v63  ;;  %v798_v4 = vadd.f32 %v794_v35, %v720_v0 }
 0x205   :  { %v852_v8 = vmax.f32 %v1659_v6, 0.0 }
 0x206   :  { %v836_v9 = vadd.f32 %v832_v3, %v795_v5 }
 0x207   :  { %v830_v16 = vpop.permute.xlu0 %829 }
 0x208   :  { %v835_v19 = vmul.f32 %v830_v16, %v807_v48  ;;  %v1661_v7 = vadd.f32 %v1010_v52, %v836_v9 }
 0x20a   :  { %v839_v33 = vadd.f32 %v835_v19, %v798_v4  ;;  %v851_v13 = vmax.f32 %v1661_v7, 0.0 }
 0x20b   :  { %v825_v10 = vpop.permute.xlu1 %824 }
 0x20c   :  { %v834_v11 = vmul.f32 %v825_v10, %v804_v30  ;;  %v855_v54 = vadd.f32 %v852_v8, %v851_v13  ;;  %v1669_v12 = vadd.f32 %v1010_v52, %v839_v33  ;;  %v893_v33 = vld [vmem:[%s1724_s8] sm:$0x1] }
 0x20d   :  { %v1012_v10 = vld [vmem:[%s1725_s9] ss:$0 sm:$0xff] }
 0x20e   :  { %v838_v14 = vadd.f32 %v834_v11, %v797_v61  ;;  %v856_v15 = vrot.slane %v855_v54, 4  ;;  %v854_v59 = vmax.f32 %v1669_v12, 0.0 }
 0x210   :  { %v1671_v21 = vadd.f32 %v1010_v52, %v838_v14  ;;  %v857_v58 = vadd.f32 %v856_v15, %v855_v54 }
 0x212   :  { %v853_v60 = vmax.f32 %v1671_v21, 0.0  ;;  %v858_v22 = vrot.slane %v857_v58, 2 }
 0x214   :  { %v862_v23 = vadd.f32 %v854_v59, %v853_v60  ;;  %v859_v24 = vadd.f32 %v858_v22, %v857_v58 }
 0x216   :  { %v863_v29 = vrot.slane %v862_v23, 4  ;;  %v860_v31 = vrot.slane %v859_v24, 1 }
 0x218   :  { %v861_v34 = vadd.f32 %v860_v31, %v859_v24  ;;  %v864_v36 = vadd.f32 %v863_v29, %v862_v23 }
 0x21a   :  { %v870_v37 = vmul.f32 %v869_v32, %v861_v34  ;;  %v865_v38 = vrot.slane %v864_v36, 2 }
 0x21c   :  { %v873_v40 = vsel %vm872_vm3, %v870_v37, 0.0  ;;  %v866_v41 = vadd.f32 %v865_v38, %v864_v36  ;;  %v931_v36 = vsub.s32 0, %v1592_v28  ;;  %v1016_v28 = vld [vmem:[%s1727_s11] ss:$0 sm:$0xff] }
 0x21d   :  { %874 = vadd.xlane.f32.xlu1 %v873_v40 }
 0x21e   :  { %v867_v42 = vrot.slane %v866_v41, 1 }
 0x220   :  { %v868_v43 = vadd.f32 %v867_v42, %v866_v41 }
 0x222   :  { %v871_v55 = vmul.f32 %v869_v32, %v868_v43  ;;  %v1015_v43 = vld [vmem:[%s1726_s10] ss:$0 sm:$0xff]  ;;  %s1346_s10 = smov [#allocation8]  }
 0x223   :  { %s980_s29 = sshll.u32 %s1346_s10, 4  ;;  %s981_s29 = int_to_ptr.vmem [resolvable:$true] %s980_s29 }
 0x224   :  { %v876_v44 = vsel %vm872_vm3, %v871_v55, 0.0  ;;  %s1308_s11 = scalar_lea.vmem %s981_s29, 512  ;;  %p1313_p3 = scmp.lt.s32.totalorder %s981_s29, %s981_s29 }
 0x225   :  { %877 = vadd.xlane.f32.xlu0 %v876_v44  ;;  %p1309_p2 = scmp.ne.s32.totalorder %s981_s29, %s1308_s11  ;;  %p1314_p4 = scmp.lt.s32.totalorder %s1308_s11, %s1308_s11 }
 0x227   :  { %p1315_p5 = por %p1314_p4, %p1313_p3 }
 0x229   :  { %p1316_p6 = pnand %p1315_p5, %p1309_p2 }
 0x23b   :  { %886 = vbcast.lane.b32.xlu0 %v1011_v56, 256 }
 0x265   :  { %v1049_v45 = vpop.f32.mrb[0].mxu1 }
 0x266   :  { %v1050_v46 = vpop.f32.mrb[1].mxu1 }
 0x267   :  { %v1051_v39 = vadd.f32 %v1050_v46, %v1049_v45 }
 0x269   :  { %v1052_v49 = vpop.f32.mrb[2].mxu1 }
 0x26a   :  { %v1053_v50 = vpop.f32.mrb[3].mxu1 }
 0x26b   :  { %v1054_v51 = vadd.f32 %v1053_v50, %v1052_v49 }
 0x26d   :  { %v1055_v25 = vpop.f32.mrb[4].mxu1 }
 0x26e   :  { %v1056_v47 = vpop.f32.mrb[5].mxu1 }
 0x26f   :  { %v1057_v26 = vadd.f32 %v1056_v47, %v1055_v25 }
 0x271   :  { %v1058_v18 = vpop.f32.mrb[6].mxu1 }
 0x272   :  { %v1059_v53 = vpop.f32.mrb[7].mxu1 }
 0x273   :  { %v1060_v27 = vadd.f32 %v1059_v53, %v1058_v18 }
 0x291   :  { %v592_v57 = vpop.f32.mrb[8].mxu1 }
 0x292   :  { %v593_v61 = vadd.f32 %v1051_v39, %v592_v57  ;;  %v594_v17 = vpop.f32.mrb[9].mxu1 }
 0x295   :  { %v597_v62 = vpop.f32.mrb[10].mxu1 }
 0x296   :  { %v598_v52 = vadd.f32 %v1054_v51, %v597_v62  ;;  %v599_v30 = vpop.f32.mrb[11].mxu1 }
 0x299   :  { %v602_v5 = vpop.f32.mrb[12].mxu1 }
 0x29a   :  { %v603_v3 = vadd.f32 %v1057_v26, %v602_v5  ;;  %v604_v4 = vpop.f32.mrb[13].mxu1 }
 0x29d   :  { %v607_v9 = vpop.f32.mrb[14].mxu1 }
 0x29e   :  { %v608_v16 = vadd.f32 %v1060_v27, %v607_v9  ;;  %v609_v19 = vpop.f32.mrb[15].mxu1 }
 0x2aa   :  { %v875_v0 = vpop.xlane.xlu1 %874 }
 0x2b2   :  { %v878_v63 = vpop.xlane.xlu0 %877 }
 0x2b6   :  { %v887_v1 = vpop.permute.xlu0 %886 }
 0x2b7   :  { %v889_v2 = vadd.f32 %v887_v1, %v875_v0  ;;  %v890_v20 = vadd.f32 %v887_v1, %v878_v63 }
 0x2b9   :  { %v891_v35 = vmax.f32 %v889_v2, 0.0  ;;  %v892_v48 = vmax.f32 %v890_v20, 0.0 }
 0x2bb   :  { %896 = vperm.xlu1 %1255, %v891_v35  }
 0x2bf   :  { %901 = vperm.xlu1 %1255, %v892_v48  }
 0x33a   :  { %v897_v11 = vpop.permute.xlu1 %896 }
 0x33b   :  { %v904_v54 = vmul.f32 %v897_v11, %v893_v33 }
 0x33d   :  { %v915_v14 = vadd.f32 %v1012_v10, %v904_v54 }
 0x33e   :  { %v902_v15 = vpop.permute.xlu1 %901 }
 0x33f   :  { %v1013_v58 = vmul.f32 -1.442695, %v915_v14  ;;  %v905_v22 = vmul.f32 %v902_v15, %v893_v33 }
 0x341   :  { %1256 = vpow2.f32 %v1013_v58  ;;  %v916_v23 = vadd.f32 %v1012_v10, %v905_v22 }
 0x343   :  { %v1014_v24 = vmul.f32 -1.442695, %v916_v23 }
 0x345   :  { %1258 = vpow2.f32 %v1014_v24 }
 0x34b   :  { %v1257_v29 = vpop.eup %1256 }
 0x34c   :  { %v923_v31 = vadd.f32 1.0, %v1257_v29 }
 0x34e   :  { %1260 = vrcp.f32 %v923_v31 }
 0x34f   :  { %v1259_v32 = vpop.eup %1258 }
 0x350   :  { %v924_v34 = vadd.f32 1.0, %v1259_v32 }
 0x352   :  { %1262 = vrcp.f32 %v924_v34 }
 0x358   :  { %v1261_v37 = vpop.eup %1260 }
 0x359   :  { %v932_v38 = vrot.slane %v1261_v37, %v931_v36 }
 0x35b   :  { %v937_v40 = vmul.f32 %v932_v38, %v851_v13  ;;  %v938_v41 = vmul.f32 %v932_v38, %v852_v8 }
 0x35c   :  { %v1263_v42 = vpop.eup %1262 }
 0x35d   :  { %v941_v55 = vadd.f32 %v937_v40, %v593_v61  ;;  %v942_v44 = vadd.f32 %v938_v41, %v598_v52  ;;  %v936_v56 = vrot.slane %v1263_v42, %v931_v36 }
 0x35f   :  { %v952_v45 = vmul.f32 %v1015_v43, %v941_v55  ;;  %v953_v46 = vmul.f32 %v1015_v43, %v942_v44  ;;  %v939_v7 = vmul.f32 %v936_v56, %v853_v60  ;;  %v940_v6 = vmul.f32 %v936_v56, %v854_v59 }
 0x361   :  { %v963_v13 = vadd.f32 %v1016_v28, %v952_v45  ;;  %v964_v8 = vadd.f32 %v1016_v28, %v953_v46  ;;  %v943_v39 = vadd.f32 %v939_v7, %v603_v3  ;;  %v944_v49 = vadd.f32 %v940_v6, %v608_v16 }
 0x363   :  { %v967_v50 = vmax.f32 %v963_v13, 0.0  ;;  %v968_v51 = vmax.f32 %v964_v8, 0.0  ;;  %v954_v25 = vmul.f32 %v1015_v43, %v943_v39  ;;  %v955_v47 = vmul.f32 %v1015_v43, %v944_v49 }
 0x365   :  { %972 = vst [vmem:[#allocation8 + $0x8] sm:$0xff] %v968_v51  ;;  %971 = vst [vmem:[#allocation8] sm:$0xff] %v967_v50  ;;  %v965_v26 = vadd.f32 %v1016_v28, %v954_v25  ;;  %v966_v18 = vadd.f32 %v1016_v28, %v955_v47 }
 0x367   :  { %v969_v53 = vmax.f32 %v965_v26, 0.0  ;;  %v970_v21 = vmax.f32 %v966_v18, 0.0 }
 0x369   :  { %973 = vst [vmem:[#allocation8 + $0x10] sm:$0xff] %v969_v53  ;;  %974 = vst [vmem:[#allocation8 + $0x18] sm:$0xff] %v970_v21 }
 0x36a   :  { %1319 = shalt.err (!%p1316_p6)
}
 0x36b   :  { %s1320_s13 = scalar_lea.hbm %s1728_s12, 512 }
 0x36c   :  { %p1321_p7 = scmp.ne.s32.totalorder %s1728_s12, %s1320_s13  ;;  %p1324_p8 = scmp.lt.u32.totalorder %s1320_s13, %s1728_s12 }
 0x36e   :  { %p1326_p9 = pnand %p1324_p8, %p1321_p7 }
 0x370   :  { %1329 = shalt.err (!%p1326_p9)
}
 0x371   :  { %s1347_s17 = smov 128  }
 0x372   :  { %986 = dma.vmem_to_hbm [thread:$0]  %s981_s29, 512, %s1728_s12, [#allocation5], %s1347_s17, %s1347_s17, %s1343_s4  }
 0x373   :  { %1334 = dma.done.wait [#allocation5], 512  }
 0x374   :  { %1335 = vsyncadd [#allocation5], 4294966784 }
 0x375   :  { %990 = vsyncpa [#allocation4], 1 }
 0x376   :  { %991 = vsyncpa [#allocation7], 1 }
 0x377   :  { %992 = vsyncpa [#allocation5], 1 }

</bundles_post_ra>
